<compile_context>
chip_gen: v6e
topology: v6e:2x2x1
jax: 0.10.0
libtpu: 0.0.40
codegen_flags: <defaults>
</compile_context>

<pallas_src>
import functools
import math

import jax
import jax.numpy as jnp
from jax.experimental import pallas as pl
from jax.experimental.pallas import tpu as pltpu


def _vmem_limit_bytes(fraction=0.75, fallback=48 * 1024 * 1024):
    """Generation-aware scoped-VMEM limit (v5e/v6e: 128 MiB, v7x: 64 MiB)."""
    try:
        info = pltpu.get_tpu_info()
        cap = getattr(info, "vmem_capacity_bytes", None)
        if cap:
            return int(cap * fraction)
    except Exception:
        pass
    return fallback


def _choose_q_tile(n, c, heads, *, in_itemsize, out_itemsize, attn_itemsize,
                   compute_itemsize, kv_buffer_count, budget_bytes):
    """Largest divisor-of-n q-tile whose full per-step working set fits."""
    # Tq-independent VMEM cost.
    fixed = 2 * kv_buffer_count * n * c * in_itemsize     # K and V pipeline buffers
    fixed += 2 * n * c * compute_itemsize                 # per-head K/V scratch copies
    avail = budget_bytes - fixed
    # Cost per row of the q tile.
    per_row = 2 * c * in_itemsize                # Q block (double-buffered)
    per_row += 2 * c * out_itemsize              # out block (double-buffered)
    per_row += 2 * heads * n * attn_itemsize     # attn block (double-buffered)
    per_row += c * 4                             # f32 out scratch
    per_row += 4 * n * 4                         # live f32 softmax intermediates
    max_tq = avail // per_row if avail > 0 else 0
    if max_tq >= n:
        return n
    t = max(8, (int(max_tq) // 8) * 8)
    while t >= 8:
        if n % t == 0:
            return t
        t -= 8
    return n  # no suitable divisor (small / odd n): fall back to full rows


def _kv_block_spec(n, c, buffer_count):
    index_map = lambda b, qi: (b, 0, 0)
    if buffer_count is not None:
        try:
            # Single-buffer K/V: their block index only changes on the (outer)
            # batch axis, so the exposed DMA happens once per batch and the
            # VMEM footprint halves (decisive on v7x's 64 MiB).
            return pl.BlockSpec((None, n, c), index_map,
                                pipeline_mode=pl.Buffered(buffer_count))
        except Exception:
            pass
    return pl.BlockSpec((None, n, c), index_map)


def _attn_kernel(q_ref, k_ref, v_ref, out_ref, attn_ref,
                 k_heads, v_heads, out_acc, *,
                 num_heads, head_dim, scale, compute_dtype):
    # q_ref: (Tq, C)   k_ref / v_ref: (N, C)   out_ref: (Tq, C)
    # attn_ref: (num_heads, Tq, N)
    # k_heads / v_heads: (num_heads, N, d) persistent per-batch scratch
    # out_acc: (Tq, C) f32 scratch, with C = num_heads * head_dim

    # Per-head K/V re-layout: once per batch (qi == 0), not per q-tile.
    @pl.when(pl.program_id(1) == 0)
    def _fill_kv():
        k = k_ref[...]
        v = v_ref[...]
        for hh in range(num_heads):
            sl = slice(hh * head_dim, (hh + 1) * head_dim)
            k_heads[hh] = k[:, sl].astype(compute_dtype)
            v_heads[hh] = v[:, sl].astype(compute_dtype)

    q = q_ref[...]
    for hh in range(num_heads):  # small static loop, fully unrolled
        sl = slice(hh * head_dim, (hh + 1) * head_dim)
        # Fold the softmax scale into the (Tq, d) query slice (N/d x cheaper
        # than scaling the (Tq, N) scores afterwards).
        q_h = (q[:, sl] * scale).astype(compute_dtype)
        k_h = k_heads[hh]
        v_h = v_heads[hh]

        # scores = q_h @ k_h^T, contracting the last axes so the MXU consumes
        # K without an explicit transpose / relayout copy.
        scores = jax.lax.dot_general(
            q_h, k_h,
            dimension_numbers=(((1,), (1,)), ((), ())),
            preferred_element_type=jnp.float32,
        )

        # Numerically-stable softmax in f32.  The reciprocal is exact and is
        # only taken on the (Tq, 1) denominator, so the returned attention
        # rows sum to 1 (parity with torch.softmax).
        m = jnp.max(scores, axis=-1, keepdims=True)
        e = jnp.exp(scores - m)
        denom = jnp.sum(e, axis=-1, keepdims=True)
        p = e * (1.0 / denom)

        attn_ref[hh] = p.astype(attn_ref.dtype)
        out_acc[:, sl] = jnp.dot(p.astype(compute_dtype), v_h,
                                 preferred_element_type=jnp.float32)

    # Single lane-dense (Tq, C) store instead of per-head partial stores.
    out_ref[...] = out_acc[...].astype(out_ref.dtype)


def multi_attn(query, key, value, head=4,
               matmul_dtype=jnp.bfloat16, attn_dtype=jnp.float32,
               kv_buffer_count=1):
    """Pallas implementation of MultiAttn.forward (mask=None, dis=None path).

    query, key, value: (B, N, C) arrays.
    Returns (out, attn): out is (B, N, C) in the input dtype, attn is
    (head, B, N, N) in `attn_dtype` (float32 by default, matching PyTorch).

    `matmul_dtype` controls the MXU-operand dtype (bf16 by default; pass None
    to keep the input dtype).  Softmax math and accumulation stay in float32.
    `attn_dtype=jnp.bfloat16` halves the HBM writeback of the attention map.
    """
    # TODO(synk): optional `mask` / `dis` arguments of the PyTorch forward are
    # not wired into the kernel (default-None path only).
    B, N, C = key.shape
    assert C % head == 0, "channels must be divisible by the number of heads"
    d = C // head

    compute_dtype = (jnp.dtype(matmul_dtype) if matmul_dtype is not None
                     else jnp.dtype(query.dtype))
    attn_dtype = jnp.dtype(attn_dtype)
    in_itemsize = jnp.dtype(query.dtype).itemsize
    vmem_limit = _vmem_limit_bytes()

    kernel = functools.partial(
        _attn_kernel, num_heads=head, head_dim=d,
        scale=1.0 / math.sqrt(d), compute_dtype=compute_dtype)

    def _build_and_call(use_buffered_kv):
        eff_kv_bufs = (kv_buffer_count
                       if (use_buffered_kv and kv_buffer_count) else 2)
        tq = _choose_q_tile(
            N, C, head,
            in_itemsize=in_itemsize,
            out_itemsize=in_itemsize,
            attn_itemsize=attn_dtype.itemsize,
            compute_itemsize=compute_dtype.itemsize,
            kv_buffer_count=eff_kv_bufs,
            budget_bytes=int(vmem_limit * 0.85),
        )
        num_q_tiles = N // tq
        kv_spec_count = kv_buffer_count if use_buffered_kv else None

        return pl.pallas_call(
            kernel,
            out_shape=(
                jax.ShapeDtypeStruct((B, N, C), query.dtype),
                jax.ShapeDtypeStruct((head, B, N, N), attn_dtype),
            ),
            grid_spec=pltpu.PrefetchScalarGridSpec(
                num_scalar_prefetch=0,
                # qi innermost: full K/V of a batch is fetched once and reused
                # across its q-tiles.
                grid=(B, num_q_tiles),
                in_specs=[
                    pl.BlockSpec((None, tq, C), lambda b, qi: (b, qi, 0)),  # Q
                    _kv_block_spec(N, C, kv_spec_count),                    # K
                    _kv_block_spec(N, C, kv_spec_count),                    # V
                ],
                out_specs=[
                    pl.BlockSpec((None, tq, C), lambda b, qi: (b, qi, 0)),
                    pl.BlockSpec((head, None, tq, N), lambda b, qi: (0, b, qi, 0)),
                ],
                scratch_shapes=[
                    pltpu.VMEM((head, N, d), compute_dtype),   # per-head K
                    pltpu.VMEM((head, N, d), compute_dtype),   # per-head V
                    pltpu.VMEM((tq, C), jnp.float32),          # out accumulator
                ],
            ),
            compiler_params=pltpu.CompilerParams(
                # The K/V head scratch is filled at qi == 0 and reused across
                # q-tiles, so the q-tile axis carries state -> "arbitrary".
                # The batch axis is independent -> "parallel" (megacore).
                dimension_semantics=("parallel", "arbitrary"),
                vmem_limit_bytes=vmem_limit,
            ),
        )(query, key, value)

    if kv_buffer_count is None:
        return _build_and_call(False)
    try:
        return _build_and_call(True)
    except Exception:
        # Fallback: default double-buffered K/V if pipeline_mode is rejected.
        return _build_and_call(False)


def _reference_multi_attn(query, key, value, head=4):
    """Plain-JAX reference mirroring the PyTorch module (for sanity check)."""
    B, N, C = key.shape
    d = C // head

    def split(x):
        return jnp.transpose(x.reshape(B, N, head, d), (2, 0, 1, 3))

    q, k, v = split(query), split(key), split(value)
    scores = jnp.einsum("hbnd,hbmd->hbnm", q, k) / math.sqrt(d)
    p = jax.nn.softmax(scores, axis=-1)
    out = jnp.einsum("hbnm,hbmd->hbnd", p, v)
    out = jnp.transpose(out, (1, 2, 0, 3)).reshape(B, N, C)
    return out, p


if __name__ == "__main__":
    B, N, C, head = 2, 8, 32, 4
    key0 = jax.random.PRNGKey(0)
    kq, kk, kv = jax.random.split(key0, 3)
    query = jax.random.normal(kq, (B, N, C), dtype=jnp.float32)
    keyx = jax.random.normal(kk, (B, N, C), dtype=jnp.float32)
    value = jax.random.normal(kv, (B, N, C), dtype=jnp.float32)

    out_ref, attn_ref = _reference_multi_attn(query, keyx, value, head=head)

    # Default path: bf16 MXU operands, f32 softmax/accumulation/attn output.
    out, attn = multi_attn(query, keyx, value, head=head)
    out = jax.block_until_ready(out)
    attn = jax.block_until_ready(attn)
    assert out.shape == (B, N, C)
    assert attn.shape == (head, B, N, N)
    assert jnp.allclose(out, out_ref, atol=5e-2, rtol=5e-2)
    assert jnp.allclose(attn, attn_ref, atol=5e-2, rtol=5e-2)

    # Full-f32 path for tight numerical parity with the PyTorch module.
    out32, attn32 = multi_attn(query, keyx, value, head=head, matmul_dtype=None)
    out32 = jax.block_until_ready(out32)
    attn32 = jax.block_until_ready(attn32)
    assert jnp.allclose(out32, out_ref, atol=2e-3, rtol=2e-3)
    assert jnp.allclose(attn32, attn_ref, atol=2e-3, rtol=2e-3)

    print("KERNEL_OK")
</pallas_src>

<mosaic_0001>
module attributes {stable_mosaic.version = 11 : i64} {
  func.func @_attn_kernel(%arg0: i32, %arg1: i32, %arg2: memref<1x8x32xf32, #tpu.memory_space<vmem>>, %arg3: memref<1x8x32xf32, #tpu.memory_space<vmem>>, %arg4: memref<1x8x32xf32, #tpu.memory_space<vmem>>, %arg5: memref<1x8x32xf32, #tpu.memory_space<vmem>>, %arg6: memref<4x1x8x8xf32, #tpu.memory_space<vmem>>, %arg7: memref<4x8x8xbf16, #tpu.memory_space<vmem>>, %arg8: memref<4x8x8xbf16, #tpu.memory_space<vmem>>, %arg9: memref<8x32xf32, #tpu.memory_space<vmem>>) attributes {dimension_semantics = [#tpu.dimension_semantics<parallel>, #tpu.dimension_semantics<arbitrary>], iteration_bounds = array<i64: 2, 1>, scalar_prefetch = 0 : i64, scratch_operands = 3 : i64, tpu.core_type = #tpu.core_type<tc>, window_params = [{transform_indices = @transform_0, window_bounds = array<i64: 1, 8, 32>}, {pipeline_mode = #tpu.pipeline_mode<synchronous>, transform_indices = @transform_1, window_bounds = array<i64: 1, 8, 32>}, {pipeline_mode = #tpu.pipeline_mode<synchronous>, transform_indices = @transform_2, window_bounds = array<i64: 1, 8, 32>}, {transform_indices = @transform_3, window_bounds = array<i64: 1, 8, 32>}, {transform_indices = @transform_4, window_bounds = array<i64: 4, 1, 8, 8>}]} {
    %c0_i32 = arith.constant 0 : i32
    %0 = arith.cmpi eq, %arg1, %c0_i32 : i32
    %1 = arith.extui %0 : i1 to i32
    %c0_i32_0 = arith.constant 0 : i32
    %2 = arith.cmpi ne, %1, %c0_i32_0 : i32
    scf.if %2 {
      %c0_73 = arith.constant 0 : index
      %c0_74 = arith.constant 0 : index
      %c0_75 = arith.constant 0 : index
      %113 = vector.load %arg3[%c0_73, %c0_74, %c0_75] : memref<1x8x32xf32, #tpu.memory_space<vmem>>, vector<1x8x32xf32>
      %114 = vector.shape_cast %113 : vector<1x8x32xf32> to vector<8x32xf32>
      %c0_76 = arith.constant 0 : index
      %c0_77 = arith.constant 0 : index
      %c0_78 = arith.constant 0 : index
      %115 = vector.load %arg4[%c0_76, %c0_77, %c0_78] : memref<1x8x32xf32, #tpu.memory_space<vmem>>, vector<1x8x32xf32>
      %116 = vector.shape_cast %115 : vector<1x8x32xf32> to vector<8x32xf32>
      %117 = vector.extract_strided_slice %114 {offsets = [0, 0], sizes = [8, 8], strides = [1, 1]} : vector<8x32xf32> to vector<8x8xf32>
      %118 = arith.truncf %117 : vector<8x8xf32> to vector<8x8xbf16>
      %c0_79 = arith.constant 0 : index
      %c0_80 = arith.constant 0 : index
      %c0_81 = arith.constant 0 : index
      %119 = vector.load %arg7[%c0_79, %c0_80, %c0_81] : memref<4x8x8xbf16, #tpu.memory_space<vmem>>, vector<1x8x8xbf16>
      %120 = vector.shape_cast %119 : vector<1x8x8xbf16> to vector<8x8xbf16>
      %121 = vector.shape_cast %118 : vector<8x8xbf16> to vector<1x8x8xbf16>
      tpu.vector_store %arg7[%c0_79, %c0_80, %c0_81], %121 {strides = array<i32>} : memref<4x8x8xbf16, #tpu.memory_space<vmem>>, vector<1x8x8xbf16>,
      %122 = vector.extract_strided_slice %116 {offsets = [0, 0], sizes = [8, 8], strides = [1, 1]} : vector<8x32xf32> to vector<8x8xf32>
      %123 = arith.truncf %122 : vector<8x8xf32> to vector<8x8xbf16>
      %c0_82 = arith.constant 0 : index
      %c0_83 = arith.constant 0 : index
      %c0_84 = arith.constant 0 : index
      %124 = vector.load %arg8[%c0_82, %c0_83, %c0_84] : memref<4x8x8xbf16, #tpu.memory_space<vmem>>, vector<1x8x8xbf16>
      %125 = vector.shape_cast %124 : vector<1x8x8xbf16> to vector<8x8xbf16>
      %126 = vector.shape_cast %123 : vector<8x8xbf16> to vector<1x8x8xbf16>
      tpu.vector_store %arg8[%c0_82, %c0_83, %c0_84], %126 {strides = array<i32>} : memref<4x8x8xbf16, #tpu.memory_space<vmem>>, vector<1x8x8xbf16>,
      %127 = vector.extract_strided_slice %114 {offsets = [0, 8], sizes = [8, 8], strides = [1, 1]} : vector<8x32xf32> to vector<8x8xf32>
      %128 = arith.truncf %127 : vector<8x8xf32> to vector<8x8xbf16>
      %c1_85 = arith.constant 1 : index
      %c0_86 = arith.constant 0 : index
      %c0_87 = arith.constant 0 : index
      %129 = vector.load %arg7[%c1_85, %c0_86, %c0_87] : memref<4x8x8xbf16, #tpu.memory_space<vmem>>, vector<1x8x8xbf16>
      %130 = vector.shape_cast %129 : vector<1x8x8xbf16> to vector<8x8xbf16>
      %131 = vector.shape_cast %128 : vector<8x8xbf16> to vector<1x8x8xbf16>
      tpu.vector_store %arg7[%c1_85, %c0_86, %c0_87], %131 {strides = array<i32>} : memref<4x8x8xbf16, #tpu.memory_space<vmem>>, vector<1x8x8xbf16>,
      %132 = vector.extract_strided_slice %116 {offsets = [0, 8], sizes = [8, 8], strides = [1, 1]} : vector<8x32xf32> to vector<8x8xf32>
      %133 = arith.truncf %132 : vector<8x8xf32> to vector<8x8xbf16>
      %c1_88 = arith.constant 1 : index
      %c0_89 = arith.constant 0 : index
      %c0_90 = arith.constant 0 : index
      %134 = vector.load %arg8[%c1_88, %c0_89, %c0_90] : memref<4x8x8xbf16, #tpu.memory_space<vmem>>, vector<1x8x8xbf16>
      %135 = vector.shape_cast %134 : vector<1x8x8xbf16> to vector<8x8xbf16>
      %136 = vector.shape_cast %133 : vector<8x8xbf16> to vector<1x8x8xbf16>
      tpu.vector_store %arg8[%c1_88, %c0_89, %c0_90], %136 {strides = array<i32>} : memref<4x8x8xbf16, #tpu.memory_space<vmem>>, vector<1x8x8xbf16>,
      %137 = vector.extract_strided_slice %114 {offsets = [0, 16], sizes = [8, 8], strides = [1, 1]} : vector<8x32xf32> to vector<8x8xf32>
      %138 = arith.truncf %137 : vector<8x8xf32> to vector<8x8xbf16>
      %c2_91 = arith.constant 2 : index
      %c0_92 = arith.constant 0 : index
      %c0_93 = arith.constant 0 : index
      %139 = vector.load %arg7[%c2_91, %c0_92, %c0_93] : memref<4x8x8xbf16, #tpu.memory_space<vmem>>, vector<1x8x8xbf16>
      %140 = vector.shape_cast %139 : vector<1x8x8xbf16> to vector<8x8xbf16>
      %141 = vector.shape_cast %138 : vector<8x8xbf16> to vector<1x8x8xbf16>
      tpu.vector_store %arg7[%c2_91, %c0_92, %c0_93], %141 {strides = array<i32>} : memref<4x8x8xbf16, #tpu.memory_space<vmem>>, vector<1x8x8xbf16>,
      %142 = vector.extract_strided_slice %116 {offsets = [0, 16], sizes = [8, 8], strides = [1, 1]} : vector<8x32xf32> to vector<8x8xf32>
      %143 = arith.truncf %142 : vector<8x8xf32> to vector<8x8xbf16>
      %c2_94 = arith.constant 2 : index
      %c0_95 = arith.constant 0 : index
      %c0_96 = arith.constant 0 : index
      %144 = vector.load %arg8[%c2_94, %c0_95, %c0_96] : memref<4x8x8xbf16, #tpu.memory_space<vmem>>, vector<1x8x8xbf16>
      %145 = vector.shape_cast %144 : vector<1x8x8xbf16> to vector<8x8xbf16>
      %146 = vector.shape_cast %143 : vector<8x8xbf16> to vector<1x8x8xbf16>
      tpu.vector_store %arg8[%c2_94, %c0_95, %c0_96], %146 {strides = array<i32>} : memref<4x8x8xbf16, #tpu.memory_space<vmem>>, vector<1x8x8xbf16>,
      %147 = vector.extract_strided_slice %114 {offsets = [0, 24], sizes = [8, 8], strides = [1, 1]} : vector<8x32xf32> to vector<8x8xf32>
      %148 = arith.truncf %147 : vector<8x8xf32> to vector<8x8xbf16>
      %c3_97 = arith.constant 3 : index
      %c0_98 = arith.constant 0 : index
      %c0_99 = arith.constant 0 : index
      %149 = vector.load %arg7[%c3_97, %c0_98, %c0_99] : memref<4x8x8xbf16, #tpu.memory_space<vmem>>, vector<1x8x8xbf16>
      %150 = vector.shape_cast %149 : vector<1x8x8xbf16> to vector<8x8xbf16>
      %151 = vector.shape_cast %148 : vector<8x8xbf16> to vector<1x8x8xbf16>
      tpu.vector_store %arg7[%c3_97, %c0_98, %c0_99], %151 {strides = array<i32>} : memref<4x8x8xbf16, #tpu.memory_space<vmem>>, vector<1x8x8xbf16>,
      %152 = vector.extract_strided_slice %116 {offsets = [0, 24], sizes = [8, 8], strides = [1, 1]} : vector<8x32xf32> to vector<8x8xf32>
      %153 = arith.truncf %152 : vector<8x8xf32> to vector<8x8xbf16>
      %c3_100 = arith.constant 3 : index
      %c0_101 = arith.constant 0 : index
      %c0_102 = arith.constant 0 : index
      %154 = vector.load %arg8[%c3_100, %c0_101, %c0_102] : memref<4x8x8xbf16, #tpu.memory_space<vmem>>, vector<1x8x8xbf16>
      %155 = vector.shape_cast %154 : vector<1x8x8xbf16> to vector<8x8xbf16>
      %156 = vector.shape_cast %153 : vector<8x8xbf16> to vector<1x8x8xbf16>
      tpu.vector_store %arg8[%c3_100, %c0_101, %c0_102], %156 {strides = array<i32>} : memref<4x8x8xbf16, #tpu.memory_space<vmem>>, vector<1x8x8xbf16>,
    } else {
    }
    %c0 = arith.constant 0 : index
    %c0_1 = arith.constant 0 : index
    %c0_2 = arith.constant 0 : index
    %3 = vector.load %arg2[%c0, %c0_1, %c0_2] : memref<1x8x32xf32, #tpu.memory_space<vmem>>, vector<1x8x32xf32>
    %4 = vector.shape_cast %3 : vector<1x8x32xf32> to vector<8x32xf32>
    %5 = vector.extract_strided_slice %4 {offsets = [0, 0], sizes = [8, 8], strides = [1, 1]} : vector<8x32xf32> to vector<8x8xf32>
    %cst = arith.constant 0.353553385 : f32
    %6 = vector.broadcast %cst : f32 to vector<8x8xf32>
    %7 = arith.mulf %5, %6 : vector<8x8xf32>
    %8 = arith.truncf %7 : vector<8x8xf32> to vector<8x8xbf16>
    %c0_3 = arith.constant 0 : index
    %c0_4 = arith.constant 0 : index
    %c0_5 = arith.constant 0 : index
    %9 = vector.load %arg7[%c0_3, %c0_4, %c0_5] : memref<4x8x8xbf16, #tpu.memory_space<vmem>>, vector<1x8x8xbf16>
    %10 = vector.shape_cast %9 : vector<1x8x8xbf16> to vector<8x8xbf16>
    %c0_6 = arith.constant 0 : index
    %c0_7 = arith.constant 0 : index
    %c0_8 = arith.constant 0 : index
    %11 = vector.load %arg8[%c0_6, %c0_7, %c0_8] : memref<4x8x8xbf16, #tpu.memory_space<vmem>>, vector<1x8x8xbf16>
    %12 = vector.shape_cast %11 : vector<1x8x8xbf16> to vector<8x8xbf16>
    %cst_9 = arith.constant dense<0.000000e+00> : vector<8x8xf32>
    %13 = tpu.matmul %8, %10, %cst_9 {dimension_numbers = #tpu.dot_dimension_numbers<[1], [1], [0], [0], [0, 0, 1, 0], [], []>} : vector<8x8xbf16>, vector<8x8xbf16>, vector<8x8xf32> -> vector<8x8xf32>
    %cst_10 = arith.constant dense<0xFF800000> : vector<8xf32>
    %14 = vector.multi_reduction <maximumf>, %13, %cst_10 [1] : vector<8x8xf32> to vector<8xf32>
    %15 = vector.shape_cast %14 : vector<8xf32> to vector<8x1xf32>
    %16 = vector.broadcast %15 : vector<8x1xf32> to vector<8x8xf32>
    %17 = arith.subf %13, %16 : vector<8x8xf32>
    %18 = math.exp %17 : vector<8x8xf32>
    %cst_11 = arith.constant dense<0.000000e+00> : vector<8xf32>
    %19 = vector.multi_reduction <add>, %18, %cst_11 [1] : vector<8x8xf32> to vector<8xf32>
    %20 = vector.shape_cast %19 : vector<8xf32> to vector<8x1xf32>
    %cst_12 = arith.constant 1.000000e+00 : f32
    %21 = vector.broadcast %cst_12 : f32 to vector<8x1xf32>
    %22 = arith.divf %21, %20 : vector<8x1xf32>
    %23 = vector.broadcast %22 : vector<8x1xf32> to vector<8x8xf32>
    %24 = arith.mulf %18, %23 : vector<8x8xf32>
    %c0_13 = arith.constant 0 : index
    %c0_14 = arith.constant 0 : index
    %c0_15 = arith.constant 0 : index
    %c0_16 = arith.constant 0 : index
    %25 = vector.load %arg6[%c0_13, %c0_14, %c0_15, %c0_16] : memref<4x1x8x8xf32, #tpu.memory_space<vmem>>, vector<1x1x8x8xf32>
    %26 = vector.shape_cast %25 : vector<1x1x8x8xf32> to vector<8x8xf32>
    %27 = vector.shape_cast %24 : vector<8x8xf32> to vector<1x1x8x8xf32>
    tpu.vector_store %arg6[%c0_13, %c0_14, %c0_15, %c0_16], %27 {strides = array<i32>} : memref<4x1x8x8xf32, #tpu.memory_space<vmem>>, vector<1x1x8x8xf32>,
    %28 = arith.truncf %24 : vector<8x8xf32> to vector<8x8xbf16>
    %cst_17 = arith.constant dense<0.000000e+00> : vector<8x8xf32>
    %29 = tpu.matmul %28, %12, %cst_17 {dimension_numbers = #tpu.dot_dimension_numbers<[1], [0], [0], [1], [0, 0, 1, 1], [], []>} : vector<8x8xbf16>, vector<8x8xbf16>, vector<8x8xf32> -> vector<8x8xf32>
    %c0_18 = arith.constant 0 : index
    %c0_19 = arith.constant 0 : index
    %30 = vector.load %arg9[%c0_18, %c0_19] : memref<8x32xf32, #tpu.memory_space<vmem>>, vector<8x8xf32>
    tpu.vector_store %arg9[%c0_18, %c0_19], %29 {strides = array<i32>} : memref<8x32xf32, #tpu.memory_space<vmem>>, vector<8x8xf32>,
    %31 = vector.extract_strided_slice %4 {offsets = [0, 8], sizes = [8, 8], strides = [1, 1]} : vector<8x32xf32> to vector<8x8xf32>
    %cst_20 = arith.constant 0.353553385 : f32
    %32 = vector.broadcast %cst_20 : f32 to vector<8x8xf32>
    %33 = arith.mulf %31, %32 : vector<8x8xf32>
    %34 = arith.truncf %33 : vector<8x8xf32> to vector<8x8xbf16>
    %c1 = arith.constant 1 : index
    %c0_21 = arith.constant 0 : index
    %c0_22 = arith.constant 0 : index
    %35 = vector.load %arg7[%c1, %c0_21, %c0_22] : memref<4x8x8xbf16, #tpu.memory_space<vmem>>, vector<1x8x8xbf16>
    %36 = vector.shape_cast %35 : vector<1x8x8xbf16> to vector<8x8xbf16>
    %c1_23 = arith.constant 1 : index
    %c0_24 = arith.constant 0 : index
    %c0_25 = arith.constant 0 : index
    %37 = vector.load %arg8[%c1_23, %c0_24, %c0_25] : memref<4x8x8xbf16, #tpu.memory_space<vmem>>, vector<1x8x8xbf16>
    %38 = vector.shape_cast %37 : vector<1x8x8xbf16> to vector<8x8xbf16>
    %cst_26 = arith.constant dense<0.000000e+00> : vector<8x8xf32>
    %39 = tpu.matmul %34, %36, %cst_26 {dimension_numbers = #tpu.dot_dimension_numbers<[1], [1], [0], [0], [0, 0, 1, 0], [], []>} : vector<8x8xbf16>, vector<8x8xbf16>, vector<8x8xf32> -> vector<8x8xf32>
    %cst_27 = arith.constant dense<0xFF800000> : vector<8xf32>
    %40 = vector.multi_reduction <maximumf>, %39, %cst_27 [1] : vector<8x8xf32> to vector<8xf32>
    %41 = vector.shape_cast %40 : vector<8xf32> to vector<8x1xf32>
    %42 = vector.broadcast %41 : vector<8x1xf32> to vector<8x8xf32>
    %43 = arith.subf %39, %42 : vector<8x8xf32>
    %44 = math.exp %43 : vector<8x8xf32>
    %cst_28 = arith.constant dense<0.000000e+00> : vector<8xf32>
    %45 = vector.multi_reduction <add>, %44, %cst_28 [1] : vector<8x8xf32> to vector<8xf32>
    %46 = vector.shape_cast %45 : vector<8xf32> to vector<8x1xf32>
    %cst_29 = arith.constant 1.000000e+00 : f32
    %47 = vector.broadcast %cst_29 : f32 to vector<8x1xf32>
    %48 = arith.divf %47, %46 : vector<8x1xf32>
    %49 = vector.broadcast %48 : vector<8x1xf32> to vector<8x8xf32>
    %50 = arith.mulf %44, %49 : vector<8x8xf32>
    %c1_30 = arith.constant 1 : index
    %c0_31 = arith.constant 0 : index
    %c0_32 = arith.constant 0 : index
    %c0_33 = arith.constant 0 : index
    %51 = vector.load %arg6[%c1_30, %c0_31, %c0_32, %c0_33] : memref<4x1x8x8xf32, #tpu.memory_space<vmem>>, vector<1x1x8x8xf32>
    %52 = vector.shape_cast %51 : vector<1x1x8x8xf32> to vector<8x8xf32>
    %53 = vector.shape_cast %50 : vector<8x8xf32> to vector<1x1x8x8xf32>
    tpu.vector_store %arg6[%c1_30, %c0_31, %c0_32, %c0_33], %53 {strides = array<i32>} : memref<4x1x8x8xf32, #tpu.memory_space<vmem>>, vector<1x1x8x8xf32>,
    %54 = arith.truncf %50 : vector<8x8xf32> to vector<8x8xbf16>
    %cst_34 = arith.constant dense<0.000000e+00> : vector<8x8xf32>
    %55 = tpu.matmul %54, %38, %cst_34 {dimension_numbers = #tpu.dot_dimension_numbers<[1], [0], [0], [1], [0, 0, 1, 1], [], []>} : vector<8x8xbf16>, vector<8x8xbf16>, vector<8x8xf32> -> vector<8x8xf32>
    %c0_35 = arith.constant 0 : index
    %c8 = arith.constant 8 : index
    %56 = vector.load %arg9[%c0_35, %c8] : memref<8x32xf32, #tpu.memory_space<vmem>>, vector<8x8xf32>
    tpu.vector_store %arg9[%c0_35, %c8], %55 {strides = array<i32>} : memref<8x32xf32, #tpu.memory_space<vmem>>, vector<8x8xf32>,
    %57 = vector.extract_strided_slice %4 {offsets = [0, 16], sizes = [8, 8], strides = [1, 1]} : vector<8x32xf32> to vector<8x8xf32>
    %cst_36 = arith.constant 0.353553385 : f32
    %58 = vector.broadcast %cst_36 : f32 to vector<8x8xf32>
    %59 = arith.mulf %57, %58 : vector<8x8xf32>
    %60 = arith.truncf %59 : vector<8x8xf32> to vector<8x8xbf16>
    %c2 = arith.constant 2 : index
    %c0_37 = arith.constant 0 : index
    %c0_38 = arith.constant 0 : index
    %61 = vector.load %arg7[%c2, %c0_37, %c0_38] : memref<4x8x8xbf16, #tpu.memory_space<vmem>>, vector<1x8x8xbf16>
    %62 = vector.shape_cast %61 : vector<1x8x8xbf16> to vector<8x8xbf16>
    %c2_39 = arith.constant 2 : index
    %c0_40 = arith.constant 0 : index
    %c0_41 = arith.constant 0 : index
    %63 = vector.load %arg8[%c2_39, %c0_40, %c0_41] : memref<4x8x8xbf16, #tpu.memory_space<vmem>>, vector<1x8x8xbf16>
    %64 = vector.shape_cast %63 : vector<1x8x8xbf16> to vector<8x8xbf16>
    %cst_42 = arith.constant dense<0.000000e+00> : vector<8x8xf32>
    %65 = tpu.matmul %60, %62, %cst_42 {dimension_numbers = #tpu.dot_dimension_numbers<[1], [1], [0], [0], [0, 0, 1, 0], [], []>} : vector<8x8xbf16>, vector<8x8xbf16>, vector<8x8xf32> -> vector<8x8xf32>
    %cst_43 = arith.constant dense<0xFF800000> : vector<8xf32>
    %66 = vector.multi_reduction <maximumf>, %65, %cst_43 [1] : vector<8x8xf32> to vector<8xf32>
    %67 = vector.shape_cast %66 : vector<8xf32> to vector<8x1xf32>
    %68 = vector.broadcast %67 : vector<8x1xf32> to vector<8x8xf32>
    %69 = arith.subf %65, %68 : vector<8x8xf32>
    %70 = math.exp %69 : vector<8x8xf32>
    %cst_44 = arith.constant dense<0.000000e+00> : vector<8xf32>
    %71 = vector.multi_reduction <add>, %70, %cst_44 [1] : vector<8x8xf32> to vector<8xf32>
    %72 = vector.shape_cast %71 : vector<8xf32> to vector<8x1xf32>
    %cst_45 = arith.constant 1.000000e+00 : f32
    %73 = vector.broadcast %cst_45 : f32 to vector<8x1xf32>
    %74 = arith.divf %73, %72 : vector<8x1xf32>
    %75 = vector.broadcast %74 : vector<8x1xf32> to vector<8x8xf32>
    %76 = arith.mulf %70, %75 : vector<8x8xf32>
    %c2_46 = arith.constant 2 : index
    %c0_47 = arith.constant 0 : index
    %c0_48 = arith.constant 0 : index
    %c0_49 = arith.constant 0 : index
    %77 = vector.load %arg6[%c2_46, %c0_47, %c0_48, %c0_49] : memref<4x1x8x8xf32, #tpu.memory_space<vmem>>, vector<1x1x8x8xf32>
    %78 = vector.shape_cast %77 : vector<1x1x8x8xf32> to vector<8x8xf32>
    %79 = vector.shape_cast %76 : vector<8x8xf32> to vector<1x1x8x8xf32>
    tpu.vector_store %arg6[%c2_46, %c0_47, %c0_48, %c0_49], %79 {strides = array<i32>} : memref<4x1x8x8xf32, #tpu.memory_space<vmem>>, vector<1x1x8x8xf32>,
    %80 = arith.truncf %76 : vector<8x8xf32> to vector<8x8xbf16>
    %cst_50 = arith.constant dense<0.000000e+00> : vector<8x8xf32>
    %81 = tpu.matmul %80, %64, %cst_50 {dimension_numbers = #tpu.dot_dimension_numbers<[1], [0], [0], [1], [0, 0, 1, 1], [], []>} : vector<8x8xbf16>, vector<8x8xbf16>, vector<8x8xf32> -> vector<8x8xf32>
    %c0_51 = arith.constant 0 : index
    %c16 = arith.constant 16 : index
    %82 = vector.load %arg9[%c0_51, %c16] : memref<8x32xf32, #tpu.memory_space<vmem>>, vector<8x8xf32>
    tpu.vector_store %arg9[%c0_51, %c16], %81 {strides = array<i32>} : memref<8x32xf32, #tpu.memory_space<vmem>>, vector<8x8xf32>,
    %83 = vector.extract_strided_slice %4 {offsets = [0, 24], sizes = [8, 8], strides = [1, 1]} : vector<8x32xf32> to vector<8x8xf32>
    %cst_52 = arith.constant 0.353553385 : f32
    %84 = vector.broadcast %cst_52 : f32 to vector<8x8xf32>
    %85 = arith.mulf %83, %84 : vector<8x8xf32>
    %86 = arith.truncf %85 : vector<8x8xf32> to vector<8x8xbf16>
    %c3 = arith.constant 3 : index
    %c0_53 = arith.constant 0 : index
    %c0_54 = arith.constant 0 : index
    %87 = vector.load %arg7[%c3, %c0_53, %c0_54] : memref<4x8x8xbf16, #tpu.memory_space<vmem>>, vector<1x8x8xbf16>
    %88 = vector.shape_cast %87 : vector<1x8x8xbf16> to vector<8x8xbf16>
    %c3_55 = arith.constant 3 : index
    %c0_56 = arith.constant 0 : index
    %c0_57 = arith.constant 0 : index
    %89 = vector.load %arg8[%c3_55, %c0_56, %c0_57] : memref<4x8x8xbf16, #tpu.memory_space<vmem>>, vector<1x8x8xbf16>
    %90 = vector.shape_cast %89 : vector<1x8x8xbf16> to vector<8x8xbf16>
    %cst_58 = arith.constant dense<0.000000e+00> : vector<8x8xf32>
    %91 = tpu.matmul %86, %88, %cst_58 {dimension_numbers = #tpu.dot_dimension_numbers<[1], [1], [0], [0], [0, 0, 1, 0], [], []>} : vector<8x8xbf16>, vector<8x8xbf16>, vector<8x8xf32> -> vector<8x8xf32>
    %cst_59 = arith.constant dense<0xFF800000> : vector<8xf32>
    %92 = vector.multi_reduction <maximumf>, %91, %cst_59 [1] : vector<8x8xf32> to vector<8xf32>
    %93 = vector.shape_cast %92 : vector<8xf32> to vector<8x1xf32>
    %94 = vector.broadcast %93 : vector<8x1xf32> to vector<8x8xf32>
    %95 = arith.subf %91, %94 : vector<8x8xf32>
    %96 = math.exp %95 : vector<8x8xf32>
    %cst_60 = arith.constant dense<0.000000e+00> : vector<8xf32>
    %97 = vector.multi_reduction <add>, %96, %cst_60 [1] : vector<8x8xf32> to vector<8xf32>
    %98 = vector.shape_cast %97 : vector<8xf32> to vector<8x1xf32>
    %cst_61 = arith.constant 1.000000e+00 : f32
    %99 = vector.broadcast %cst_61 : f32 to vector<8x1xf32>
    %100 = arith.divf %99, %98 : vector<8x1xf32>
    %101 = vector.broadcast %100 : vector<8x1xf32> to vector<8x8xf32>
    %102 = arith.mulf %96, %101 : vector<8x8xf32>
    %c3_62 = arith.constant 3 : index
    %c0_63 = arith.constant 0 : index
    %c0_64 = arith.constant 0 : index
    %c0_65 = arith.constant 0 : index
    %103 = vector.load %arg6[%c3_62, %c0_63, %c0_64, %c0_65] : memref<4x1x8x8xf32, #tpu.memory_space<vmem>>, vector<1x1x8x8xf32>
    %104 = vector.shape_cast %103 : vector<1x1x8x8xf32> to vector<8x8xf32>
    %105 = vector.shape_cast %102 : vector<8x8xf32> to vector<1x1x8x8xf32>
    tpu.vector_store %arg6[%c3_62, %c0_63, %c0_64, %c0_65], %105 {strides = array<i32>} : memref<4x1x8x8xf32, #tpu.memory_space<vmem>>, vector<1x1x8x8xf32>,
    %106 = arith.truncf %102 : vector<8x8xf32> to vector<8x8xbf16>
    %cst_66 = arith.constant dense<0.000000e+00> : vector<8x8xf32>
    %107 = tpu.matmul %106, %90, %cst_66 {dimension_numbers = #tpu.dot_dimension_numbers<[1], [0], [0], [1], [0, 0, 1, 1], [], []>} : vector<8x8xbf16>, vector<8x8xbf16>, vector<8x8xf32> -> vector<8x8xf32>
    %c0_67 = arith.constant 0 : index
    %c24 = arith.constant 24 : index
    %108 = vector.load %arg9[%c0_67, %c24] : memref<8x32xf32, #tpu.memory_space<vmem>>, vector<8x8xf32>
    tpu.vector_store %arg9[%c0_67, %c24], %107 {strides = array<i32>} : memref<8x32xf32, #tpu.memory_space<vmem>>, vector<8x8xf32>,
    %c0_68 = arith.constant 0 : index
    %c0_69 = arith.constant 0 : index
    %109 = vector.load %arg9[%c0_68, %c0_69] : memref<8x32xf32, #tpu.memory_space<vmem>>, vector<8x32xf32>
    %c0_70 = arith.constant 0 : index
    %c0_71 = arith.constant 0 : index
    %c0_72 = arith.constant 0 : index
    %110 = vector.load %arg5[%c0_70, %c0_71, %c0_72] : memref<1x8x32xf32, #tpu.memory_space<vmem>>, vector<1x8x32xf32>
    %111 = vector.shape_cast %110 : vector<1x8x32xf32> to vector<8x32xf32>
    %112 = vector.shape_cast %109 : vector<8x32xf32> to vector<1x8x32xf32>
    tpu.vector_store %arg5[%c0_70, %c0_71, %c0_72], %112 {strides = array<i32>} : memref<1x8x32xf32, #tpu.memory_space<vmem>>, vector<1x8x32xf32>,
    return
  }
  func.func @transform_0(%arg0: i32, %arg1: i32) -> (i32, i32, i32) {
    %c0_i32 = arith.constant 0 : i32
    %c0_i32_0 = arith.constant 0 : i32
    return %arg0, %arg1, %c0_i32 : i32, i32, i32
  }
  func.func @transform_1(%arg0: i32, %arg1: i32) -> (i32, i32, i32) {
    %c0_i32 = arith.constant 0 : i32
    %c0_i32_0 = arith.constant 0 : i32
    %c0_i32_1 = arith.constant 0 : i32
    return %arg0, %c0_i32, %c0_i32_0 : i32, i32, i32
  }
  func.func @transform_2(%arg0: i32, %arg1: i32) -> (i32, i32, i32) {
    %c0_i32 = arith.constant 0 : i32
    %c0_i32_0 = arith.constant 0 : i32
    %c0_i32_1 = arith.constant 0 : i32
    return %arg0, %c0_i32, %c0_i32_0 : i32, i32, i32
  }
  func.func @transform_3(%arg0: i32, %arg1: i32) -> (i32, i32, i32) {
    %c0_i32 = arith.constant 0 : i32
    %c0_i32_0 = arith.constant 0 : i32
    return %arg0, %arg1, %c0_i32 : i32, i32, i32
  }
  func.func @transform_4(%arg0: i32, %arg1: i32) -> (i32, i32, i32, i32) {
    %c0_i32 = arith.constant 0 : i32
    %c0_i32_0 = arith.constant 0 : i32
    %c0_i32_1 = arith.constant 0 : i32
    return %c0_i32, %arg0, %arg1, %c0_i32_0 : i32, i32, i32, i32
  }
}

module attributes {stable_mosaic.version = 11 : i64} {
  func.func @_attn_kernel(%arg0: i32, %arg1: i32, %arg2: memref<1x8x32xf32, #tpu.memory_space<vmem>>, %arg3: memref<1x8x32xf32, #tpu.memory_space<vmem>>, %arg4: memref<1x8x32xf32, #tpu.memory_space<vmem>>, %arg5: memref<1x8x32xf32, #tpu.memory_space<vmem>>, %arg6: memref<4x1x8x8xf32, #tpu.memory_space<vmem>>, %arg7: memref<4x8x8xbf16, #tpu.memory_space<vmem>>, %arg8: memref<4x8x8xbf16, #tpu.memory_space<vmem>>, %arg9: memref<8x32xf32, #tpu.memory_space<vmem>>) attributes {dimension_semantics = [#tpu.dimension_semantics<parallel>, #tpu.dimension_semantics<arbitrary>], iteration_bounds = array<i64: 2, 1>, scalar_prefetch = 0 : i64, scratch_operands = 3 : i64, tpu.core_type = #tpu.core_type<tc>, window_params = [{transform_indices = @transform_0, window_bounds = array<i64: 1, 8, 32>}, {transform_indices = @transform_1, window_bounds = array<i64: 1, 8, 32>}, {transform_indices = @transform_2, window_bounds = array<i64: 1, 8, 32>}, {transform_indices = @transform_3, window_bounds = array<i64: 1, 8, 32>}, {transform_indices = @transform_4, window_bounds = array<i64: 4, 1, 8, 8>}]} {
    %c0_i32 = arith.constant 0 : i32
    %0 = arith.cmpi eq, %arg1, %c0_i32 : i32
    %1 = arith.extui %0 : i1 to i32
    %c0_i32_0 = arith.constant 0 : i32
    %2 = arith.cmpi ne, %1, %c0_i32_0 : i32
    scf.if %2 {
      %c0_73 = arith.constant 0 : index
      %c0_74 = arith.constant 0 : index
      %c0_75 = arith.constant 0 : index
      %113 = vector.load %arg3[%c0_73, %c0_74, %c0_75] : memref<1x8x32xf32, #tpu.memory_space<vmem>>, vector<1x8x32xf32>
      %114 = vector.shape_cast %113 : vector<1x8x32xf32> to vector<8x32xf32>
      %c0_76 = arith.constant 0 : index
      %c0_77 = arith.constant 0 : index
      %c0_78 = arith.constant 0 : index
      %115 = vector.load %arg4[%c0_76, %c0_77, %c0_78] : memref<1x8x32xf32, #tpu.memory_space<vmem>>, vector<1x8x32xf32>
      %116 = vector.shape_cast %115 : vector<1x8x32xf32> to vector<8x32xf32>
      %117 = vector.extract_strided_slice %114 {offsets = [0, 0], sizes = [8, 8], strides = [1, 1]} : vector<8x32xf32> to vector<8x8xf32>
      %118 = arith.truncf %117 : vector<8x8xf32> to vector<8x8xbf16>
      %c0_79 = arith.constant 0 : index
      %c0_80 = arith.constant 0 : index
      %c0_81 = arith.constant 0 : index
      %119 = vector.load %arg7[%c0_79, %c0_80, %c0_81] : memref<4x8x8xbf16, #tpu.memory_space<vmem>>, vector<1x8x8xbf16>
      %120 = vector.shape_cast %119 : vector<1x8x8xbf16> to vector<8x8xbf16>
      %121 = vector.shape_cast %118 : vector<8x8xbf16> to vector<1x8x8xbf16>
      tpu.vector_store %arg7[%c0_79, %c0_80, %c0_81], %121 {strides = array<i32>} : memref<4x8x8xbf16, #tpu.memory_space<vmem>>, vector<1x8x8xbf16>,
      %122 = vector.extract_strided_slice %116 {offsets = [0, 0], sizes = [8, 8], strides = [1, 1]} : vector<8x32xf32> to vector<8x8xf32>
      %123 = arith.truncf %122 : vector<8x8xf32> to vector<8x8xbf16>
      %c0_82 = arith.constant 0 : index
      %c0_83 = arith.constant 0 : index
      %c0_84 = arith.constant 0 : index
      %124 = vector.load %arg8[%c0_82, %c0_83, %c0_84] : memref<4x8x8xbf16, #tpu.memory_space<vmem>>, vector<1x8x8xbf16>
      %125 = vector.shape_cast %124 : vector<1x8x8xbf16> to vector<8x8xbf16>
      %126 = vector.shape_cast %123 : vector<8x8xbf16> to vector<1x8x8xbf16>
      tpu.vector_store %arg8[%c0_82, %c0_83, %c0_84], %126 {strides = array<i32>} : memref<4x8x8xbf16, #tpu.memory_space<vmem>>, vector<1x8x8xbf16>,
      %127 = vector.extract_strided_slice %114 {offsets = [0, 8], sizes = [8, 8], strides = [1, 1]} : vector<8x32xf32> to vector<8x8xf32>
      %128 = arith.truncf %127 : vector<8x8xf32> to vector<8x8xbf16>
      %c1_85 = arith.constant 1 : index
      %c0_86 = arith.constant 0 : index
      %c0_87 = arith.constant 0 : index
      %129 = vector.load %arg7[%c1_85, %c0_86, %c0_87] : memref<4x8x8xbf16, #tpu.memory_space<vmem>>, vector<1x8x8xbf16>
      %130 = vector.shape_cast %129 : vector<1x8x8xbf16> to vector<8x8xbf16>
      %131 = vector.shape_cast %128 : vector<8x8xbf16> to vector<1x8x8xbf16>
      tpu.vector_store %arg7[%c1_85, %c0_86, %c0_87], %131 {strides = array<i32>} : memref<4x8x8xbf16, #tpu.memory_space<vmem>>, vector<1x8x8xbf16>,
      %132 = vector.extract_strided_slice %116 {offsets = [0, 8], sizes = [8, 8], strides = [1, 1]} : vector<8x32xf32> to vector<8x8xf32>
      %133 = arith.truncf %132 : vector<8x8xf32> to vector<8x8xbf16>
      %c1_88 = arith.constant 1 : index
      %c0_89 = arith.constant 0 : index
      %c0_90 = arith.constant 0 : index
      %134 = vector.load %arg8[%c1_88, %c0_89, %c0_90] : memref<4x8x8xbf16, #tpu.memory_space<vmem>>, vector<1x8x8xbf16>
      %135 = vector.shape_cast %134 : vector<1x8x8xbf16> to vector<8x8xbf16>
      %136 = vector.shape_cast %133 : vector<8x8xbf16> to vector<1x8x8xbf16>
      tpu.vector_store %arg8[%c1_88, %c0_89, %c0_90], %136 {strides = array<i32>} : memref<4x8x8xbf16, #tpu.memory_space<vmem>>, vector<1x8x8xbf16>,
      %137 = vector.extract_strided_slice %114 {offsets = [0, 16], sizes = [8, 8], strides = [1, 1]} : vector<8x32xf32> to vector<8x8xf32>
      %138 = arith.truncf %137 : vector<8x8xf32> to vector<8x8xbf16>
      %c2_91 = arith.constant 2 : index
      %c0_92 = arith.constant 0 : index
      %c0_93 = arith.constant 0 : index
      %139 = vector.load %arg7[%c2_91, %c0_92, %c0_93] : memref<4x8x8xbf16, #tpu.memory_space<vmem>>, vector<1x8x8xbf16>
      %140 = vector.shape_cast %139 : vector<1x8x8xbf16> to vector<8x8xbf16>
      %141 = vector.shape_cast %138 : vector<8x8xbf16> to vector<1x8x8xbf16>
      tpu.vector_store %arg7[%c2_91, %c0_92, %c0_93], %141 {strides = array<i32>} : memref<4x8x8xbf16, #tpu.memory_space<vmem>>, vector<1x8x8xbf16>,
      %142 = vector.extract_strided_slice %116 {offsets = [0, 16], sizes = [8, 8], strides = [1, 1]} : vector<8x32xf32> to vector<8x8xf32>
      %143 = arith.truncf %142 : vector<8x8xf32> to vector<8x8xbf16>
      %c2_94 = arith.constant 2 : index
      %c0_95 = arith.constant 0 : index
      %c0_96 = arith.constant 0 : index
      %144 = vector.load %arg8[%c2_94, %c0_95, %c0_96] : memref<4x8x8xbf16, #tpu.memory_space<vmem>>, vector<1x8x8xbf16>
      %145 = vector.shape_cast %144 : vector<1x8x8xbf16> to vector<8x8xbf16>
      %146 = vector.shape_cast %143 : vector<8x8xbf16> to vector<1x8x8xbf16>
      tpu.vector_store %arg8[%c2_94, %c0_95, %c0_96], %146 {strides = array<i32>} : memref<4x8x8xbf16, #tpu.memory_space<vmem>>, vector<1x8x8xbf16>,
      %147 = vector.extract_strided_slice %114 {offsets = [0, 24], sizes = [8, 8], strides = [1, 1]} : vector<8x32xf32> to vector<8x8xf32>
      %148 = arith.truncf %147 : vector<8x8xf32> to vector<8x8xbf16>
      %c3_97 = arith.constant 3 : index
      %c0_98 = arith.constant 0 : index
      %c0_99 = arith.constant 0 : index
      %149 = vector.load %arg7[%c3_97, %c0_98, %c0_99] : memref<4x8x8xbf16, #tpu.memory_space<vmem>>, vector<1x8x8xbf16>
      %150 = vector.shape_cast %149 : vector<1x8x8xbf16> to vector<8x8xbf16>
      %151 = vector.shape_cast %148 : vector<8x8xbf16> to vector<1x8x8xbf16>
      tpu.vector_store %arg7[%c3_97, %c0_98, %c0_99], %151 {strides = array<i32>} : memref<4x8x8xbf16, #tpu.memory_space<vmem>>, vector<1x8x8xbf16>,
      %152 = vector.extract_strided_slice %116 {offsets = [0, 24], sizes = [8, 8], strides = [1, 1]} : vector<8x32xf32> to vector<8x8xf32>
      %153 = arith.truncf %152 : vector<8x8xf32> to vector<8x8xbf16>
      %c3_100 = arith.constant 3 : index
      %c0_101 = arith.constant 0 : index
      %c0_102 = arith.constant 0 : index
      %154 = vector.load %arg8[%c3_100, %c0_101, %c0_102] : memref<4x8x8xbf16, #tpu.memory_space<vmem>>, vector<1x8x8xbf16>
      %155 = vector.shape_cast %154 : vector<1x8x8xbf16> to vector<8x8xbf16>
      %156 = vector.shape_cast %153 : vector<8x8xbf16> to vector<1x8x8xbf16>
      tpu.vector_store %arg8[%c3_100, %c0_101, %c0_102], %156 {strides = array<i32>} : memref<4x8x8xbf16, #tpu.memory_space<vmem>>, vector<1x8x8xbf16>,
    } else {
    }
    %c0 = arith.constant 0 : index
    %c0_1 = arith.constant 0 : index
    %c0_2 = arith.constant 0 : index
    %3 = vector.load %arg2[%c0, %c0_1, %c0_2] : memref<1x8x32xf32, #tpu.memory_space<vmem>>, vector<1x8x32xf32>
    %4 = vector.shape_cast %3 : vector<1x8x32xf32> to vector<8x32xf32>
    %5 = vector.extract_strided_slice %4 {offsets = [0, 0], sizes = [8, 8], strides = [1, 1]} : vector<8x32xf32> to vector<8x8xf32>
    %cst = arith.constant 0.353553385 : f32
    %6 = vector.broadcast %cst : f32 to vector<8x8xf32>
    %7 = arith.mulf %5, %6 : vector<8x8xf32>
    %8 = arith.truncf %7 : vector<8x8xf32> to vector<8x8xbf16>
    %c0_3 = arith.constant 0 : index
    %c0_4 = arith.constant 0 : index
    %c0_5 = arith.constant 0 : index
    %9 = vector.load %arg7[%c0_3, %c0_4, %c0_5] : memref<4x8x8xbf16, #tpu.memory_space<vmem>>, vector<1x8x8xbf16>
    %10 = vector.shape_cast %9 : vector<1x8x8xbf16> to vector<8x8xbf16>
    %c0_6 = arith.constant 0 : index
    %c0_7 = arith.constant 0 : index
    %c0_8 = arith.constant 0 : index
    %11 = vector.load %arg8[%c0_6, %c0_7, %c0_8] : memref<4x8x8xbf16, #tpu.memory_space<vmem>>, vector<1x8x8xbf16>
    %12 = vector.shape_cast %11 : vector<1x8x8xbf16> to vector<8x8xbf16>
    %cst_9 = arith.constant dense<0.000000e+00> : vector<8x8xf32>
    %13 = tpu.matmul %8, %10, %cst_9 {dimension_numbers = #tpu.dot_dimension_numbers<[1], [1], [0], [0], [0, 0, 1, 0], [], []>} : vector<8x8xbf16>, vector<8x8xbf16>, vector<8x8xf32> -> vector<8x8xf32>
    %cst_10 = arith.constant dense<0xFF800000> : vector<8xf32>
    %14 = vector.multi_reduction <maximumf>, %13, %cst_10 [1] : vector<8x8xf32> to vector<8xf32>
    %15 = vector.shape_cast %14 : vector<8xf32> to vector<8x1xf32>
    %16 = vector.broadcast %15 : vector<8x1xf32> to vector<8x8xf32>
    %17 = arith.subf %13, %16 : vector<8x8xf32>
    %18 = math.exp %17 : vector<8x8xf32>
    %cst_11 = arith.constant dense<0.000000e+00> : vector<8xf32>
    %19 = vector.multi_reduction <add>, %18, %cst_11 [1] : vector<8x8xf32> to vector<8xf32>
    %20 = vector.shape_cast %19 : vector<8xf32> to vector<8x1xf32>
    %cst_12 = arith.constant 1.000000e+00 : f32
    %21 = vector.broadcast %cst_12 : f32 to vector<8x1xf32>
    %22 = arith.divf %21, %20 : vector<8x1xf32>
    %23 = vector.broadcast %22 : vector<8x1xf32> to vector<8x8xf32>
    %24 = arith.mulf %18, %23 : vector<8x8xf32>
    %c0_13 = arith.constant 0 : index
    %c0_14 = arith.constant 0 : index
    %c0_15 = arith.constant 0 : index
    %c0_16 = arith.constant 0 : index
    %25 = vector.load %arg6[%c0_13, %c0_14, %c0_15, %c0_16] : memref<4x1x8x8xf32, #tpu.memory_space<vmem>>, vector<1x1x8x8xf32>
    %26 = vector.shape_cast %25 : vector<1x1x8x8xf32> to vector<8x8xf32>
    %27 = vector.shape_cast %24 : vector<8x8xf32> to vector<1x1x8x8xf32>
    tpu.vector_store %arg6[%c0_13, %c0_14, %c0_15, %c0_16], %27 {strides = array<i32>} : memref<4x1x8x8xf32, #tpu.memory_space<vmem>>, vector<1x1x8x8xf32>,
    %28 = arith.truncf %24 : vector<8x8xf32> to vector<8x8xbf16>
    %cst_17 = arith.constant dense<0.000000e+00> : vector<8x8xf32>
    %29 = tpu.matmul %28, %12, %cst_17 {dimension_numbers = #tpu.dot_dimension_numbers<[1], [0], [0], [1], [0, 0, 1, 1], [], []>} : vector<8x8xbf16>, vector<8x8xbf16>, vector<8x8xf32> -> vector<8x8xf32>
    %c0_18 = arith.constant 0 : index
    %c0_19 = arith.constant 0 : index
    %30 = vector.load %arg9[%c0_18, %c0_19] : memref<8x32xf32, #tpu.memory_space<vmem>>, vector<8x8xf32>
    tpu.vector_store %arg9[%c0_18, %c0_19], %29 {strides = array<i32>} : memref<8x32xf32, #tpu.memory_space<vmem>>, vector<8x8xf32>,
    %31 = vector.extract_strided_slice %4 {offsets = [0, 8], sizes = [8, 8], strides = [1, 1]} : vector<8x32xf32> to vector<8x8xf32>
    %cst_20 = arith.constant 0.353553385 : f32
    %32 = vector.broadcast %cst_20 : f32 to vector<8x8xf32>
    %33 = arith.mulf %31, %32 : vector<8x8xf32>
    %34 = arith.truncf %33 : vector<8x8xf32> to vector<8x8xbf16>
    %c1 = arith.constant 1 : index
    %c0_21 = arith.constant 0 : index
    %c0_22 = arith.constant 0 : index
    %35 = vector.load %arg7[%c1, %c0_21, %c0_22] : memref<4x8x8xbf16, #tpu.memory_space<vmem>>, vector<1x8x8xbf16>
    %36 = vector.shape_cast %35 : vector<1x8x8xbf16> to vector<8x8xbf16>
    %c1_23 = arith.constant 1 : index
    %c0_24 = arith.constant 0 : index
    %c0_25 = arith.constant 0 : index
    %37 = vector.load %arg8[%c1_23, %c0_24, %c0_25] : memref<4x8x8xbf16, #tpu.memory_space<vmem>>, vector<1x8x8xbf16>
    %38 = vector.shape_cast %37 : vector<1x8x8xbf16> to vector<8x8xbf16>
    %cst_26 = arith.constant dense<0.000000e+00> : vector<8x8xf32>
    %39 = tpu.matmul %34, %36, %cst_26 {dimension_numbers = #tpu.dot_dimension_numbers<[1], [1], [0], [0], [0, 0, 1, 0], [], []>} : vector<8x8xbf16>, vector<8x8xbf16>, vector<8x8xf32> -> vector<8x8xf32>
    %cst_27 = arith.constant dense<0xFF800000> : vector<8xf32>
    %40 = vector.multi_reduction <maximumf>, %39, %cst_27 [1] : vector<8x8xf32> to vector<8xf32>
    %41 = vector.shape_cast %40 : vector<8xf32> to vector<8x1xf32>
    %42 = vector.broadcast %41 : vector<8x1xf32> to vector<8x8xf32>
    %43 = arith.subf %39, %42 : vector<8x8xf32>
    %44 = math.exp %43 : vector<8x8xf32>
    %cst_28 = arith.constant dense<0.000000e+00> : vector<8xf32>
    %45 = vector.multi_reduction <add>, %44, %cst_28 [1] : vector<8x8xf32> to vector<8xf32>
    %46 = vector.shape_cast %45 : vector<8xf32> to vector<8x1xf32>
    %cst_29 = arith.constant 1.000000e+00 : f32
    %47 = vector.broadcast %cst_29 : f32 to vector<8x1xf32>
    %48 = arith.divf %47, %46 : vector<8x1xf32>
    %49 = vector.broadcast %48 : vector<8x1xf32> to vector<8x8xf32>
    %50 = arith.mulf %44, %49 : vector<8x8xf32>
    %c1_30 = arith.constant 1 : index
    %c0_31 = arith.constant 0 : index
    %c0_32 = arith.constant 0 : index
    %c0_33 = arith.constant 0 : index
    %51 = vector.load %arg6[%c1_30, %c0_31, %c0_32, %c0_33] : memref<4x1x8x8xf32, #tpu.memory_space<vmem>>, vector<1x1x8x8xf32>
    %52 = vector.shape_cast %51 : vector<1x1x8x8xf32> to vector<8x8xf32>
    %53 = vector.shape_cast %50 : vector<8x8xf32> to vector<1x1x8x8xf32>
    tpu.vector_store %arg6[%c1_30, %c0_31, %c0_32, %c0_33], %53 {strides = array<i32>} : memref<4x1x8x8xf32, #tpu.memory_space<vmem>>, vector<1x1x8x8xf32>,
    %54 = arith.truncf %50 : vector<8x8xf32> to vector<8x8xbf16>
    %cst_34 = arith.constant dense<0.000000e+00> : vector<8x8xf32>
    %55 = tpu.matmul %54, %38, %cst_34 {dimension_numbers = #tpu.dot_dimension_numbers<[1], [0], [0], [1], [0, 0, 1, 1], [], []>} : vector<8x8xbf16>, vector<8x8xbf16>, vector<8x8xf32> -> vector<8x8xf32>
    %c0_35 = arith.constant 0 : index
    %c8 = arith.constant 8 : index
    %56 = vector.load %arg9[%c0_35, %c8] : memref<8x32xf32, #tpu.memory_space<vmem>>, vector<8x8xf32>
    tpu.vector_store %arg9[%c0_35, %c8], %55 {strides = array<i32>} : memref<8x32xf32, #tpu.memory_space<vmem>>, vector<8x8xf32>,
    %57 = vector.extract_strided_slice %4 {offsets = [0, 16], sizes = [8, 8], strides = [1, 1]} : vector<8x32xf32> to vector<8x8xf32>
    %cst_36 = arith.constant 0.353553385 : f32
    %58 = vector.broadcast %cst_36 : f32 to vector<8x8xf32>
    %59 = arith.mulf %57, %58 : vector<8x8xf32>
    %60 = arith.truncf %59 : vector<8x8xf32> to vector<8x8xbf16>
    %c2 = arith.constant 2 : index
    %c0_37 = arith.constant 0 : index
    %c0_38 = arith.constant 0 : index
    %61 = vector.load %arg7[%c2, %c0_37, %c0_38] : memref<4x8x8xbf16, #tpu.memory_space<vmem>>, vector<1x8x8xbf16>
    %62 = vector.shape_cast %61 : vector<1x8x8xbf16> to vector<8x8xbf16>
    %c2_39 = arith.constant 2 : index
    %c0_40 = arith.constant 0 : index
    %c0_41 = arith.constant 0 : index
    %63 = vector.load %arg8[%c2_39, %c0_40, %c0_41] : memref<4x8x8xbf16, #tpu.memory_space<vmem>>, vector<1x8x8xbf16>
    %64 = vector.shape_cast %63 : vector<1x8x8xbf16> to vector<8x8xbf16>
    %cst_42 = arith.constant dense<0.000000e+00> : vector<8x8xf32>
    %65 = tpu.matmul %60, %62, %cst_42 {dimension_numbers = #tpu.dot_dimension_numbers<[1], [1], [0], [0], [0, 0, 1, 0], [], []>} : vector<8x8xbf16>, vector<8x8xbf16>, vector<8x8xf32> -> vector<8x8xf32>
    %cst_43 = arith.constant dense<0xFF800000> : vector<8xf32>
    %66 = vector.multi_reduction <maximumf>, %65, %cst_43 [1] : vector<8x8xf32> to vector<8xf32>
    %67 = vector.shape_cast %66 : vector<8xf32> to vector<8x1xf32>
    %68 = vector.broadcast %67 : vector<8x1xf32> to vector<8x8xf32>
    %69 = arith.subf %65, %68 : vector<8x8xf32>
    %70 = math.exp %69 : vector<8x8xf32>
    %cst_44 = arith.constant dense<0.000000e+00> : vector<8xf32>
    %71 = vector.multi_reduction <add>, %70, %cst_44 [1] : vector<8x8xf32> to vector<8xf32>
    %72 = vector.shape_cast %71 : vector<8xf32> to vector<8x1xf32>
    %cst_45 = arith.constant 1.000000e+00 : f32
    %73 = vector.broadcast %cst_45 : f32 to vector<8x1xf32>
    %74 = arith.divf %73, %72 : vector<8x1xf32>
    %75 = vector.broadcast %74 : vector<8x1xf32> to vector<8x8xf32>
    %76 = arith.mulf %70, %75 : vector<8x8xf32>
    %c2_46 = arith.constant 2 : index
    %c0_47 = arith.constant 0 : index
    %c0_48 = arith.constant 0 : index
    %c0_49 = arith.constant 0 : index
    %77 = vector.load %arg6[%c2_46, %c0_47, %c0_48, %c0_49] : memref<4x1x8x8xf32, #tpu.memory_space<vmem>>, vector<1x1x8x8xf32>
    %78 = vector.shape_cast %77 : vector<1x1x8x8xf32> to vector<8x8xf32>
    %79 = vector.shape_cast %76 : vector<8x8xf32> to vector<1x1x8x8xf32>
    tpu.vector_store %arg6[%c2_46, %c0_47, %c0_48, %c0_49], %79 {strides = array<i32>} : memref<4x1x8x8xf32, #tpu.memory_space<vmem>>, vector<1x1x8x8xf32>,
    %80 = arith.truncf %76 : vector<8x8xf32> to vector<8x8xbf16>
    %cst_50 = arith.constant dense<0.000000e+00> : vector<8x8xf32>
    %81 = tpu.matmul %80, %64, %cst_50 {dimension_numbers = #tpu.dot_dimension_numbers<[1], [0], [0], [1], [0, 0, 1, 1], [], []>} : vector<8x8xbf16>, vector<8x8xbf16>, vector<8x8xf32> -> vector<8x8xf32>
    %c0_51 = arith.constant 0 : index
    %c16 = arith.constant 16 : index
    %82 = vector.load %arg9[%c0_51, %c16] : memref<8x32xf32, #tpu.memory_space<vmem>>, vector<8x8xf32>
    tpu.vector_store %arg9[%c0_51, %c16], %81 {strides = array<i32>} : memref<8x32xf32, #tpu.memory_space<vmem>>, vector<8x8xf32>,
    %83 = vector.extract_strided_slice %4 {offsets = [0, 24], sizes = [8, 8], strides = [1, 1]} : vector<8x32xf32> to vector<8x8xf32>
    %cst_52 = arith.constant 0.353553385 : f32
    %84 = vector.broadcast %cst_52 : f32 to vector<8x8xf32>
    %85 = arith.mulf %83, %84 : vector<8x8xf32>
    %86 = arith.truncf %85 : vector<8x8xf32> to vector<8x8xbf16>
    %c3 = arith.constant 3 : index
    %c0_53 = arith.constant 0 : index
    %c0_54 = arith.constant 0 : index
    %87 = vector.load %arg7[%c3, %c0_53, %c0_54] : memref<4x8x8xbf16, #tpu.memory_space<vmem>>, vector<1x8x8xbf16>
    %88 = vector.shape_cast %87 : vector<1x8x8xbf16> to vector<8x8xbf16>
    %c3_55 = arith.constant 3 : index
    %c0_56 = arith.constant 0 : index
    %c0_57 = arith.constant 0 : index
    %89 = vector.load %arg8[%c3_55, %c0_56, %c0_57] : memref<4x8x8xbf16, #tpu.memory_space<vmem>>, vector<1x8x8xbf16>
    %90 = vector.shape_cast %89 : vector<1x8x8xbf16> to vector<8x8xbf16>
    %cst_58 = arith.constant dense<0.000000e+00> : vector<8x8xf32>
    %91 = tpu.matmul %86, %88, %cst_58 {dimension_numbers = #tpu.dot_dimension_numbers<[1], [1], [0], [0], [0, 0, 1, 0], [], []>} : vector<8x8xbf16>, vector<8x8xbf16>, vector<8x8xf32> -> vector<8x8xf32>
    %cst_59 = arith.constant dense<0xFF800000> : vector<8xf32>
    %92 = vector.multi_reduction <maximumf>, %91, %cst_59 [1] : vector<8x8xf32> to vector<8xf32>
    %93 = vector.shape_cast %92 : vector<8xf32> to vector<8x1xf32>
    %94 = vector.broadcast %93 : vector<8x1xf32> to vector<8x8xf32>
    %95 = arith.subf %91, %94 : vector<8x8xf32>
    %96 = math.exp %95 : vector<8x8xf32>
    %cst_60 = arith.constant dense<0.000000e+00> : vector<8xf32>
    %97 = vector.multi_reduction <add>, %96, %cst_60 [1] : vector<8x8xf32> to vector<8xf32>
    %98 = vector.shape_cast %97 : vector<8xf32> to vector<8x1xf32>
    %cst_61 = arith.constant 1.000000e+00 : f32
    %99 = vector.broadcast %cst_61 : f32 to vector<8x1xf32>
    %100 = arith.divf %99, %98 : vector<8x1xf32>
    %101 = vector.broadcast %100 : vector<8x1xf32> to vector<8x8xf32>
    %102 = arith.mulf %96, %101 : vector<8x8xf32>
    %c3_62 = arith.constant 3 : index
    %c0_63 = arith.constant 0 : index
    %c0_64 = arith.constant 0 : index
    %c0_65 = arith.constant 0 : index
    %103 = vector.load %arg6[%c3_62, %c0_63, %c0_64, %c0_65] : memref<4x1x8x8xf32, #tpu.memory_space<vmem>>, vector<1x1x8x8xf32>
    %104 = vector.shape_cast %103 : vector<1x1x8x8xf32> to vector<8x8xf32>
    %105 = vector.shape_cast %102 : vector<8x8xf32> to vector<1x1x8x8xf32>
    tpu.vector_store %arg6[%c3_62, %c0_63, %c0_64, %c0_65], %105 {strides = array<i32>} : memref<4x1x8x8xf32, #tpu.memory_space<vmem>>, vector<1x1x8x8xf32>,
    %106 = arith.truncf %102 : vector<8x8xf32> to vector<8x8xbf16>
    %cst_66 = arith.constant dense<0.000000e+00> : vector<8x8xf32>
    %107 = tpu.matmul %106, %90, %cst_66 {dimension_numbers = #tpu.dot_dimension_numbers<[1], [0], [0], [1], [0, 0, 1, 1], [], []>} : vector<8x8xbf16>, vector<8x8xbf16>, vector<8x8xf32> -> vector<8x8xf32>
    %c0_67 = arith.constant 0 : index
    %c24 = arith.constant 24 : index
    %108 = vector.load %arg9[%c0_67, %c24] : memref<8x32xf32, #tpu.memory_space<vmem>>, vector<8x8xf32>
    tpu.vector_store %arg9[%c0_67, %c24], %107 {strides = array<i32>} : memref<8x32xf32, #tpu.memory_space<vmem>>, vector<8x8xf32>,
    %c0_68 = arith.constant 0 : index
    %c0_69 = arith.constant 0 : index
    %109 = vector.load %arg9[%c0_68, %c0_69] : memref<8x32xf32, #tpu.memory_space<vmem>>, vector<8x32xf32>
    %c0_70 = arith.constant 0 : index
    %c0_71 = arith.constant 0 : index
    %c0_72 = arith.constant 0 : index
    %110 = vector.load %arg5[%c0_70, %c0_71, %c0_72] : memref<1x8x32xf32, #tpu.memory_space<vmem>>, vector<1x8x32xf32>
    %111 = vector.shape_cast %110 : vector<1x8x32xf32> to vector<8x32xf32>
    %112 = vector.shape_cast %109 : vector<8x32xf32> to vector<1x8x32xf32>
    tpu.vector_store %arg5[%c0_70, %c0_71, %c0_72], %112 {strides = array<i32>} : memref<1x8x32xf32, #tpu.memory_space<vmem>>, vector<1x8x32xf32>,
    return
  }
  func.func @transform_0(%arg0: i32, %arg1: i32) -> (i32, i32, i32) {
    %c0_i32 = arith.constant 0 : i32
    %c0_i32_0 = arith.constant 0 : i32
    return %arg0, %arg1, %c0_i32 : i32, i32, i32
  }
  func.func @transform_1(%arg0: i32, %arg1: i32) -> (i32, i32, i32) {
    %c0_i32 = arith.constant 0 : i32
    %c0_i32_0 = arith.constant 0 : i32
    %c0_i32_1 = arith.constant 0 : i32
    return %arg0, %c0_i32, %c0_i32_0 : i32, i32, i32
  }
  func.func @transform_2(%arg0: i32, %arg1: i32) -> (i32, i32, i32) {
    %c0_i32 = arith.constant 0 : i32
    %c0_i32_0 = arith.constant 0 : i32
    %c0_i32_1 = arith.constant 0 : i32
    return %arg0, %c0_i32, %c0_i32_0 : i32, i32, i32
  }
  func.func @transform_3(%arg0: i32, %arg1: i32) -> (i32, i32, i32) {
    %c0_i32 = arith.constant 0 : i32
    %c0_i32_0 = arith.constant 0 : i32
    return %arg0, %arg1, %c0_i32 : i32, i32, i32
  }
  func.func @transform_4(%arg0: i32, %arg1: i32) -> (i32, i32, i32, i32) {
    %c0_i32 = arith.constant 0 : i32
    %c0_i32_0 = arith.constant 0 : i32
    %c0_i32_1 = arith.constant 0 : i32
    return %c0_i32, %arg0, %arg1, %c0_i32_0 : i32, i32, i32, i32
  }
}

</mosaic_0001>

<bundles_post_ra>
// kernel: tpu_custom_call.1
= control target key start
LH: loop header
LB: loop body
LE: loop exit
PB: predicated region body
PF: predicated region fallthrough
CT: control target
= control target key end

     0   :  { %10 = vsyncpa [#allocation6], 0  ;;  %s1754_s0 = inlined_call_operand.hbm [shape: f32[2,8,32], index: 0, kind: input, shape index: {}]   ;;  %s1755_s1 = inlined_call_operand.hbm [shape: f32[2,8,32], index: 1, kind: input, shape index: {}]   ;;  %s1756_s2 = inlined_call_operand.hbm [shape: f32[2,8,32], index: 2, kind: input, shape index: {}]   ;;  %s1757_s3 = inlined_call_operand.hbm [shape: f32[2,8,32], index: 3, kind: output, shape index: {0}]   ;;  %s1758_s4 = inlined_call_operand.hbm [shape: f32[4,2,8,8], index: 4, kind: output, shape index: {1}]  }
   0x1   :  { %12 = vsyncpa [#allocation6 + $0x1], 0 }
   0x2   :  { %13 = vsyncpa [#allocation9], 0 }
   0x3   :  { %14 = vsyncpa [#allocation7], 0 }
   0x4   :  { %16 = vsyncpa [#allocation7 + $0x1], 0 }
   0x5   :  { %17 = vsyncpa [#allocation13], 0 }
   0x6   :  { %19 = vsyncpa [#allocation13 + $0x1], 0  ;;  %s1420_s15 = smov 0   ;;  %s1422_s16 = smov 0  }
   0x7   :  { %s1424_s17 = smov 0   ;;  %s1426_s18 = smov 0  }
   0x8   :  { %s1428_s19 = smov 0   ;;  %s1430_s20 = smov 0  }
   0x9 LB: > { %s977_s21 = sadd.s32 4294967295, %s1378_s20   ;;  %s978_s22 = sadd.s32 4294967294, %s1378_s20   ;;  %s1378_s20 = sphi %s1430_s20, %s25_s20   ;;  %s1374_s19 = sphi %s1428_s19, %s1778_s19   ;;  %s1370_s18 = sphi %s1426_s18, %s1777_s18   ;;  %s1366_s17 = sphi %s1424_s17, %s1776_s17   ;;  %s1362_s16 = sphi %s1422_s16, %s1775_s16   ;;  %s1358_s15 = sphi %s1420_s15, %s1774_s15  }
   0xa   : > { %p59_p0 = scmp.ne.s32.totalorder %s1362_s16, %s1358_s15  ;;  %p60_p1 = scmp.eq.s32.totalorder %s977_s21, 0 }
   0xb   : > { %p1452_p2 = scmp.eq.s32.totalorder %s977_s21, 1  ;;  %p143_p3 = scmp.eq.s32.totalorder %s978_s22, 1 }
   0xc   : > { %p1456_p4 = por %p60_p1, %p59_p0  ;;  %p979_p5 = scmp.ge.s32.totalorder %s1378_s20, 1 }
   0xd   : > { %s1762_s23 = scalar_select %p1452_p2, 1, 0 }
   0xe   : > { %s1763_s24 = scalar_select %p1456_p4, 1, 0 }
   0xf   : > { %p1461_p6 = por %p143_p3, %p59_p0  ;;  %p178_p7 = scmp.lt.s32.totalorder %s1378_s20, 3 }
  0x10   : > { %s1466_s26 = sshll.u32 %s1370_s18, 7  ;;  %s1380_s5 = smov [#allocation8]  }
  0x11   : > { %s1764_s25 = scalar_select %p1461_p6, 1, 0 }
  0x12   : > { %p1468_p8 = pnand %p979_p5, %p178_p7  ;;  %s1476_s30 = scalar_lea.hbm %s1755_s1, %s1466_s26 }
  0x13   : > { %s193_s6 = sshll.u32 %s1380_s5, 4  ;;  %s1485_s9 = scalar_lea.hbm %s1756_s2, %s1466_s26  ;;  %s194_s6 = int_to_ptr.vmem [resolvable:$true] %s193_s6 }
  0x14   : > { %s1765_s27 = scalar_select %p1468_p8, 1, 0 }
  0x15   : > { %p1084_p10 = pneg %p1468_p8  ;;  %s1381_s11 = smov [#allocation10]  }
  0x16   : > { %s206_s12 = sshll.u32 %s1381_s11, 4  ;;  %s1180_s13 = scalar_lea.hbm %s1476_s30, 128  ;;  %s1493_s12 = int_to_ptr.vmem [resolvable:$true] %s206_s12 }
  0x17   : > { %p1489_p11 = pnand %p1084_p10, %p1456_p4  ;;  %p1181_p12 = scmp.ne.s32.totalorder %s1476_s30, %s1180_s13 }
  0x18   : > { %s1185_s21 = scalar_lea.hbm %s1755_s1, 256  ;;  %p1186_p3 = scmp.lt.s32.totalorder %s1476_s30, %s1755_s1 }
  0x19   : > { %p1182_p13 = pneg %p1489_p11  ;;  %p1187_p5 = scmp.lt.s32.totalorder %s1185_s21, %s1180_s13 }
  0x1b   : > { %p1183_p0 = pnand %p1182_p13, %p1181_p12  ;;  %p1188_p7 = por %p1187_p5, %p1186_p3 }
  0x1d   : > { %p1184_p1 = pneg %p1183_p0 }
  0x1f   : > { %p1189_p10 = pnand %p1188_p7, %p1184_p1 }
  0x21   : > { %1192 = shalt.err (!%p1189_p10)
}
  0x22   : > { %s1193_s29 = scalar_lea.vmem %s194_s6, 128  ;;  %p1201_p0 = scmp.lt.s32.totalorder %s194_s6, %s194_s6 }
  0x23   : > { %p1194_p9 = scmp.ne.s32.totalorder %s194_s6, %s1193_s29  ;;  %p1202_p4 = scmp.lt.s32.totalorder %s1193_s29, %s1193_s29 }
  0x25   : > { %p1196_p6 = pnand %p1194_p9, %p1182_p13  ;;  %p1203_p8 = por %p1202_p4, %p1201_p0 }
  0x27   : > { %p1197_p12 = pneg %p1196_p6 }
  0x29   : > { %p1204_p2 = pnand %p1203_p8, %p1197_p12 }
  0x2b   : > { %1207 = shalt.err (!%p1204_p2)
}
  0x2c   : > { %1087 = dma.hbm_to_vmem [thread:$0]  (!%p1489_p11), %s1476_s30, 128, %s194_s6, [#allocation9]  }
  0x2d   : > { %s1208_s5 = scalar_lea.hbm %s1485_s9, 128  ;;  %s1213_s11 = scalar_lea.hbm %s1756_s2, 256 }
  0x2e   : > { %p1209_p1 = scmp.ne.s32.totalorder %s1485_s9, %s1208_s5  ;;  %p1214_p2 = scmp.lt.s32.totalorder %s1485_s9, %s1756_s2 }
  0x2f   : > { %p1215_p4 = scmp.lt.s32.totalorder %s1213_s11, %s1208_s5 }
  0x30   : > { %p1211_p3 = pnand %p1209_p1, %p1182_p13 }
  0x31   : > { %p1216_p6 = por %p1215_p4, %p1214_p2 }
  0x32   : > { %p1212_p9 = pneg %p1211_p3 }
  0x34   : > { %p1217_p8 = pnand %p1216_p6, %p1212_p9 }
  0x36   : > { %1220 = shalt.err (!%p1217_p8)
}
  0x37   : > { %s1221_s30 = scalar_lea.vmem %s1493_s12, 128  ;;  %p1229_p12 = scmp.lt.s32.totalorder %s1493_s12, %s1493_s12 }
  0x38   : > { %p1222_p5 = scmp.ne.s32.totalorder %s1493_s12, %s1221_s30  ;;  %p1230_p0 = scmp.lt.s32.totalorder %s1221_s30, %s1221_s30 }
  0x3a   : > { %p1224_p7 = pnand %p1222_p5, %p1182_p13  ;;  %p1231_p1 = por %p1230_p0, %p1229_p12 }
  0x3c   : > { %p1225_p10 = pneg %p1224_p7 }
  0x3e   : > { %p1232_p3 = pnand %p1231_p1, %p1225_p10 }
  0x40   : > { %1235 = shalt.err (!%p1232_p3)
}
  0x41   : > { %1090 = dma.hbm_to_vmem [thread:$0]  (!%p1489_p11), %s1485_s9, 128, %s1493_s12, [#allocation9]  }
  0x42   : > { %s37_s6 = sadd.s32 1, %s1374_s19  ;;  %s46_s18 = sadd.s32 1, %s1366_s17 }
  0x43   : > { %p39_p13 = scmp.ge.s32.totalorder %s37_s6, 2  ;;  %p53_p9 = scmp.ne.s32.totalorder %s1366_s17, %s1362_s16 }
  0x44   : > { %p54_p2 = scmp.eq.s32.totalorder %s1378_s20, 0  ;;  %p1102_p4 = scmp.lt.s32.totalorder %s1378_s20, 2 }
  0x45   : > { %s1780_s6 = smov (%p39_p13, %s37_s6), 0  ;;  %p1767_p8 = scmp.ne.s32.totalorder %s1762_s23, 0 }
  0x46   : > { %p55_p6 = por %p54_p2, %p53_p9  ;;  %s41_s21 = ssub.s32 %s1374_s19, %s1780_s6 }
  0x47   : > { %p1548_p5 = por %p1767_p8, %p53_p9  ;;  %s217_s22 = sand.u32 1, %s1366_s17  }
  0x48   : > { %p44_p7 = scmp.eq.s32.totalorder %s41_s21, 0  ;;  %s983_s9 = sshll.u32 %s217_s22, 3 }
  0x49   : > { %s984_s12 = sshll.u32 %s1374_s19, 7  ;;  %s221_s8 = scalar_lea.vmem [#allocation5], %s983_s9 }
  0x4a   : > { %s1557_s28 = scalar_select %p44_p7, %s1366_s17, %s46_s18  }
  0x4b   : > { %s227_s7 = scalar_lea.hbm %s1754_s0, %s984_s12  ;;  %s229_s11 = sshll.u32 %s221_s8, 4  ;;  %s230_s11 = int_to_ptr.vmem [resolvable:$true] %s229_s11 }
  0x4c   : > { %p1564_p11 = pnand %p1102_p4, %p55_p6  ;;  %s218_s13 = scalar_lea.sflag [#allocation6], %s217_s22 }
  0x4d   : > { %s1249_s14 = scalar_lea.vmem %s230_s11, 128  ;;  %s1382_s30 = smov [#allocation5]  }
  0x4e   : > { %p1238_p10 = pneg %p1564_p11  ;;  %p1250_p12 = scmp.ne.s32.totalorder %s230_s11, %s1249_s14 }
  0x4f   : > { %s1254_s18 = sshll.u32 %s1382_s30, 4  ;;  %s1255_s18 = int_to_ptr.vmem [resolvable:$false] %s1254_s18 }
  0x50   : > { %p1252_p0 = pnand %p1250_p12, %p1238_p10  ;;  %s1256_s21 = scalar_lea.vmem %s1255_s18, 256 }
  0x51   : > { %p1257_p3 = scmp.lt.s32.totalorder %s230_s11, %s1255_s18  ;;  %p1258_p13 = scmp.lt.s32.totalorder %s1256_s21, %s1249_s14 }
  0x52   : > { %p1253_p1 = pneg %p1252_p0 }
  0x53   : > { %p1259_p9 = por %p1258_p13, %p1257_p3 }
  0x55   : > { %p1260_p2 = pnand %p1259_p9, %p1253_p1 }
  0x57   : > { %1263 = shalt.err (!%p1260_p2)
}
  0x58   : > { %1094 = dma.hbm_to_vmem [thread:$0]  (!%p1564_p11), %s227_s7, 128, %s230_s11, %s218_s13  }
  0x59   : > { %p1770_p4 = scmp.ne.s32.totalorder %s1765_s27, 0 }
  0x5a   : > { %s1575_s22 = sand.u32 (!%p1770_p4), 1, %s1362_s16   ;;  %p1771_p6 = scmp.ne.s32.totalorder (!%p1770_p4), %s1763_s24, 0 }
  0x5b   : > { %238 = sbr.rel (%p1770_p4) target bundleno = 1536 (0x600), region = 32  ;;  %s986_s9 = sshll.u32 (!%p1770_p4), %s1575_s22, 3 }
  0x5c   : > { %s241_s12 = scalar_lea.sflag (!%p1770_p4), [#allocation6], %s1575_s22  ;;  %s244_s29 = scalar_lea.vmem (!%p1770_p4), [#allocation5], %s986_s9 }
  0x60   : > { %1341 = dma.done.wait (%p1771_p6), %s241_s12, 128  }
  0x61   : > { %1343 = vsyncadd (%p1771_p6), %s241_s12, 4294967168 }
  0x62   : > { %1345 = dma.done.wait (%p1771_p6), [#allocation9], 256  }
  0x63   : > { %1347 = vsyncadd (%p1771_p6), [#allocation9], 4294967040  ;;  %v1383_v0 = vmov 0.0   ;;  %vm1384_vm0 = vmmov 0   ;;  %v287_v1 = vld [vmem:[#allocation8] sm:$0xff]  ;;  %vm290_vm1 = vcmask 60416   ;;  %s1678_s18 = scalar_lea.hbm %s1758_s4, %s1466_s26 }
  0x64   : > { %1026 = vmatprep.subr.bf16.mxu0 %v1383_v0  ;;  %1028 = vmatprep.mubr.msk.bf16.mxu0 %vm1384_vm0, %v1383_v0  ;;  %v289_v2 = vpack.c.bf16 %v287_v1, %v287_v1  ;;  %vm335_vm2 = vcmask 64512   ;;  %v330_v3 = vld [vmem:[%s244_s29] sm:$0xff]  ;;  %s1385_s24 = smov 120   ;;  %s1386_s27 = smov 112   ;;  %v288_v19 = vld [vmem:[#allocation10] sm:$0xff]  ;;  %vm399_vm3 = vcmask 1043456  }
  0x65   : > { %1032 = vmatprep.subr.bf16.mxu1 %v1383_v0  ;;  %1034 = vmatprep.mubr.msk.bf16.mxu1 %vm1384_vm0, %v1383_v0  ;;  %v331_v6 = vmul.f32 0.35355338, %v330_v3  ;;  %s1387_s5 = smov 104   ;;  %v1609_v20 = vpack.c.bf16 %v288_v19, %v288_v19  ;;  %s988_s7 = sshll.u32 %s1575_s22, 5 }
  0x66   : > { %291 = vst.msk [vmem:[#allocation2] sm:$0xf] %vm290_vm1, %v289_v2  ;;  %297 = vrot.lane.b32.xlu1 %v289_v2, %s1385_s24  ;;  %s1619_s8 = scalar_lea.vmem [#allocation12], %s988_s7  ;;  %s1388_s11 = smov 8  }
  0x67   : > { %v332_v7 = vpack.c.bf16 %v331_v6, %v331_v6  ;;  %293 = vst.msk [vmem:[#allocation3] sm:$0xf] %vm290_vm1, %v1609_v20  ;;  %s1389_s23 = smov 16   ;;  %s838_s13 = sshll.u32 %s1619_s8, 4  ;;  %s1680_s13 = int_to_ptr.vmem [resolvable:$true] %s838_s13 }
  0x68   : > { %s811_s21 = scalar_lea.sflag [#allocation13], %s1575_s22  ;;  %s1264_s12 = scalar_lea.vmem %s1680_s13, 512 }
  0x69   : > { %p1265_p8 = scmp.ne.s32.totalorder %s1680_s13, %s1264_s12  ;;  %s1390_s29 = smov [#allocation12]  }
  0x6a   : > { %310 = vrot.lane.b32.xlu1 %v289_v2, %s1386_s27 }
  0x6b   : > { %p1266_p7 = pnand %p1265_p8, %p1548_p5 }
  0x6d   : > { %v333_v4 = vld [vmem:[#allocation2] sm:$0xf]  ;;  %p1267_p11 = pneg %p1266_p7 }
  0x6e   : > { %v340_v5 = vsel %vm335_vm2, %v333_v4, 0  ;;  %449 = vrot.lane.b32.xlu1 %v332_v7, %s1385_s24  ;;  %v334_v22 = vld [vmem:[#allocation3] sm:$0xf] }
  0x6f   : > { %1027 = vmatpush3.bf16.xpose.msra.mxu0 %v340_v5  ;;  %v401_v23 = vsel %vm399_vm3, %v334_v22, 0 }
  0x70   : > { %1044 = vmatprep.subr.bf16.mxu0 %v1383_v0  ;;  %1033 = vmatpush3.bf16.msra.mxu1 %v401_v23 }
  0x71   : > { %1038 = vmatprep.subr.bf16.mxu1 %v1383_v0 }
  0x72   : > { %568 = vrot.lane.b32.xlu1 %v332_v7, %s1386_s27 }
  0x76   : > { %1029 = vmatmul.mubr.msk.bf16.vlgmr.msra.gmra.mxu0 %vm335_vm2, %v332_v7  ;;  %687 = vrot.lane.b32.xlu1 %v332_v7, %s1387_s5 }
  0x77   : > { %1046 = vmatprep.mubr.msk.bf16.mxu0 %vm1384_vm0, %v1383_v0 }
  0xd8   : > { %v298_v18 = vpop.permute.xlu1 %297 }
  0xd9   : > { %301 = vst.msk [vmem:[#allocation2 + $0x4] sm:$0xf] %vm290_vm1, %v298_v18 }
  0xdc   : > { %v311_v21 = vpop.permute.xlu1 %310 }
  0xdd   : > { %314 = vst.msk [vmem:[#allocation2 + $0x8] sm:$0xf] %vm290_vm1, %v311_v21 }
  0xe0   : > { %v445_v27 = vld [vmem:[#allocation2 + $0x4] sm:$0xf]  ;;  %v450_v32 = vpop.permute.xlu1 %449 }
  0xe1   : > { %v455_v30 = vsel %vm335_vm2, %v445_v27, 0 }
  0xe4   : > { %v565_v31 = vld [vmem:[#allocation2 + $0x8] sm:$0xf]  ;;  %v569_v35 = vpop.permute.xlu1 %568 }
  0xe5   : > { %v574_v33 = vsel %vm335_vm2, %v565_v31, 0 }
  0xe8   : > { %v688_v37 = vpop.permute.xlu1 %687 }
 0x136   : > { %v376_v8 = vpop.f32.mrf.mxu0 }
 0x137   : > { %v382_v9 = vsel %vm335_vm2, %v376_v8, -inf }
 0x138   : > { %383 = vmax.xlane.f32.xlu0 %v382_v9  ;;  %v1030_v10 = vpop.f32.mrf.mxu0 }
 0x13a   : > { %v379_v11 = vpop.f32.mrf.mxu0 }
 0x13c   : > { %v1031_v12 = vpop.f32.mrf.mxu0 }
 0x1c1   : > { %v384_v13 = vpop.xlane.xlu0 %383 }
 0x1c2   : > { %v385_v14 = vsub.f32 %v376_v8, %v384_v13 }
 0x1c4   : > { %v386_v15 = vmul.f32 1.442695, %v385_v14 }
 0x1c6   : > { %1164 = vpow2.f32 %v386_v15 }
 0x1d3   : > { %v1165_v16 = vpop.eup %1164 }
 0x1d4   : > { %v388_v17 = vsel %vm335_vm2, %v1165_v16, 0.0 }
 0x1d5   : > { %389 = vadd.xlane.f32.xlu0 %v388_v17 }
 0x1eb   : > { %320 = vrot.lane.b32.xlu0 %v289_v2, %s1387_s5 }
 0x25e   : > { %v390_v24 = vpop.xlane.xlu0 %389 }
 0x25f   : > { %1166 = vrcp.f32 %v390_v24 }
 0x262   : > { %v321_v25 = vpop.permute.xlu0 %320 }
 0x263   : > { %324 = vst.msk [vmem:[#allocation2 + $0xc] sm:$0xf] %vm290_vm1, %v321_v25 }
 0x26a   : > { %v684_v34 = vld [vmem:[#allocation2 + $0xc] sm:$0xf] }
 0x26b   : > { %v693_v36 = vsel %vm335_vm2, %v684_v34, 0 }
 0x26c   : > { %v1167_v26 = vpop.eup %1166 }
 0x26d   : > { %v393_v28 = vmul.f32 %v1167_v26, %v1165_v16 }
 0x26f   : > { %394 = vst.msk [vmem:[%s1619_s8] sm:$0xff] %vm335_vm2, %v393_v28  ;;  %v395_v29 = vpack.c.bf16 %v393_v28, %v393_v28 }
 0x271   : > { %1035 = vmatmul.mubr.msk.bf16.vlgmr.msra.gmra.mxu1 %vm335_vm2, %v395_v29 }
 0x272   : > { %1039 = vmatpush3.bf16.xpose.msra.mxu1 %v455_v30  ;;  %1040 = vmatprep.mubr.msk.bf16.mxu1 %vm1384_vm0, %v1383_v0 }
 0x273   : > { %1050 = vmatprep.subr.bf16.mxu1 %v1383_v0 }
 0x279   : > { %1041 = vmatmul.mubr.msk.bf16.vlgmr.msra.gmra.mxu1 %vm335_vm2, %v450_v32 }
 0x27a   : > { %1051 = vmatpush3.bf16.xpose.msra.mxu1 %v574_v33  ;;  %1052 = vmatprep.mubr.msk.bf16.mxu1 %vm1384_vm0, %v1383_v0 }
 0x27b   : > { %1062 = vmatprep.subr.bf16.mxu1 %v1383_v0 }
 0x281   : > { %1053 = vmatmul.mubr.msk.bf16.vlgmr.msra.gmra.mxu1 %vm335_vm2, %v569_v35 }
 0x282   : > { %1063 = vmatpush3.bf16.xpose.msra.mxu1 %v693_v36  ;;  %1064 = vmatprep.mubr.msk.bf16.mxu1 %vm1384_vm0, %v1383_v0 }
 0x289   : > { %1065 = vmatmul.mubr.msk.bf16.vlgmr.msra.gmra.mxu1 %vm335_vm2, %v688_v37 }
 0x331   : > { %v437_v38 = vpop.f32.mrf.mxu1 }
 0x332   : > { %443 = vst.msk [vmem:[#allocation4] sm:$0xff] %vm335_vm2, %v437_v38 }
 0x333   : > { %v1036_v39 = vpop.f32.mrf.mxu1 }
 0x335   : > { %v440_v40 = vpop.f32.mrf.mxu1 }
 0x337   : > { %v1037_v41 = vpop.f32.mrf.mxu1 }
 0x339   : > { %v491_v42 = vpop.f32.mrf.mxu1 }
 0x33a   : > { %v497_v43 = vsel %vm335_vm2, %v491_v42, -inf }
 0x33b   : > { %498 = vmax.xlane.f32.xlu1 %v497_v43  ;;  %v1042_v44 = vpop.f32.mrf.mxu1 }
 0x33d   : > { %v494_v45 = vpop.f32.mrf.mxu1 }
 0x33f   : > { %v1043_v46 = vpop.f32.mrf.mxu1 }
 0x341   : > { %v610_v47 = vpop.f32.mrf.mxu1 }
 0x342   : > { %v616_v48 = vsel %vm335_vm2, %v610_v47, -inf }
 0x343   : > { %617 = vmax.xlane.f32.xlu0 %v616_v48  ;;  %v1054_v49 = vpop.f32.mrf.mxu1 }
 0x345   : > { %v613_v50 = vpop.f32.mrf.mxu1 }
 0x347   : > { %v1055_v51 = vpop.f32.mrf.mxu1 }
 0x349   : > { %v729_v52 = vpop.f32.mrf.mxu1 }
 0x34a   : > { %v735_v53 = vsel %vm335_vm2, %v729_v52, -inf }
 0x34b   : > { %736 = vmax.xlane.f32.xlu1 %v735_v53  ;;  %v1066_v54 = vpop.f32.mrf.mxu1 }
 0x34d   : > { %v732_v55 = vpop.f32.mrf.mxu1 }
 0x34f   : > { %v1067_v56 = vpop.f32.mrf.mxu1 }
 0x3c4   : > { %v499_v57 = vpop.xlane.xlu1 %498 }
 0x3c5   : > { %v500_v58 = vsub.f32 %v491_v42, %v499_v57 }
 0x3c7   : > { %v501_v59 = vmul.f32 1.442695, %v500_v58 }
 0x3c9   : > { %1168 = vpow2.f32 %v501_v59 }
 0x3cc   : > { %v618_v60 = vpop.xlane.xlu0 %617 }
 0x3cd   : > { %v619_v61 = vsub.f32 %v610_v47, %v618_v60 }
 0x3cf   : > { %v620_v62 = vmul.f32 1.442695, %v619_v61 }
 0x3d1   : > { %1170 = vpow2.f32 %v620_v62 }
 0x3d4   : > { %v737_v4 = vpop.xlane.xlu1 %736 }
 0x3d5   : > { %v738_v5 = vsub.f32 %v729_v52, %v737_v4 }
 0x3d6   : > { %v1169_v63 = vpop.eup %1168 }
 0x3d7   : > { %v503_v1 = vsel %vm335_vm2, %v1169_v63, 0.0  ;;  %v739_v6 = vmul.f32 1.442695, %v738_v5 }
 0x3d8   : > { %504 = vadd.xlane.f32.xlu1 %v503_v1 }
 0x3d9   : > { %1172 = vpow2.f32 %v739_v6 }
 0x3de   : > { %v1171_v2 = vpop.eup %1170 }
 0x3df   : > { %v622_v3 = vsel %vm335_vm2, %v1171_v2, 0.0 }
 0x3e0   : > { %623 = vadd.xlane.f32.xlu0 %v622_v3 }
 0x3e6   : > { %v1173_v7 = vpop.eup %1172 }
 0x3e7   : > { %v741_v8 = vsel %vm335_vm2, %v1173_v7, 0.0 }
 0x3e9   : > { %315 = vrot.lane.b32.xlu1 %v1609_v20, %s1386_s27 }
 0x3f6   : > { %305 = vrot.lane.b32.xlu0 %v1609_v20, %s1385_s24  ;;  %s1268_s24 = sshll.u32 %s1390_s29, 4  ;;  %s1269_s24 = int_to_ptr.vmem [resolvable:$false] %s1268_s24 }
 0x3f7   : > { %s1270_s27 = scalar_lea.vmem %s1269_s24, 1024  ;;  %p1271_p10 = scmp.lt.s32.totalorder %s1680_s13, %s1269_s24 }
 0x3f8   : > { %p1272_p12 = scmp.lt.s32.totalorder %s1270_s27, %s1264_s12 }
 0x3fa   : > { %p1273_p0 = por %p1272_p12, %p1271_p10 }
 0x3fc   : > { %p1274_p1 = pnand %p1273_p0, %p1267_p11 }
 0x40d   : > { %742 = vadd.xlane.f32.xlu1 %v741_v8 }
 0x41e   : > { %325 = vrot.lane.b32.xlu1 %v1609_v20, %s1387_s5 }
 0x461   : > { %v505_v9 = vpop.xlane.xlu1 %504 }
 0x462   : > { %1174 = vrcp.f32 %v505_v9 }
 0x465   : > { %v316_v10 = vpop.permute.xlu1 %315 }
 0x466   : > { %319 = vst.msk [vmem:[#allocation3 + $0x8] sm:$0xf] %vm290_vm1, %v316_v10 }
 0x469   : > { %v624_v11 = vpop.xlane.xlu0 %623 }
 0x46a   : > { %1176 = vrcp.f32 %v624_v11 }
 0x46d   : > { %v306_v12 = vpop.permute.xlu0 %305  ;;  %v567_v18 = vld [vmem:[#allocation3 + $0x8] sm:$0xf] }
 0x46e   : > { %309 = vst.msk [vmem:[#allocation3 + $0x4] sm:$0xf] %vm290_vm1, %v306_v12  ;;  %v635_v21 = vsel %vm399_vm3, %v567_v18, 0 }
 0x46f   : > { %v1175_v13 = vpop.eup %1174 }
 0x470   : > { %v508_v14 = vmul.f32 %v1175_v13, %v1169_v63 }
 0x472   : > { %994 = vst.msk [vmem:[%s1619_s8 + $0x8] sm:$0xff] %vm335_vm2, %v508_v14  ;;  %v511_v19 = vpack.c.bf16 %v508_v14, %v508_v14 }
 0x475   : > { %v447_v15 = vld [vmem:[#allocation3 + $0x4] sm:$0xf] }
 0x476   : > { %v516_v16 = vsel %vm399_vm3, %v447_v15, 0 }
 0x477   : > { %v1177_v17 = vpop.eup %1176  ;;  %1045 = vmatpush3.bf16.msra.mxu0 %v516_v16 }
 0x478   : > { %1056 = vmatprep.subr.bf16.mxu0 %v1383_v0  ;;  %v627_v20 = vmul.f32 %v1177_v17, %v1171_v2 }
 0x47a   : > { %1047 = vmatmul.mubr.msk.bf16.vlgmr.msra.gmra.mxu0 %vm335_vm2, %v511_v19  ;;  %997 = vst.msk [vmem:[%s1619_s8 + $0x10] sm:$0xff] %vm335_vm2, %v627_v20  ;;  %v630_v22 = vpack.c.bf16 %v627_v20, %v627_v20 }
 0x47b   : > { %1057 = vmatpush3.bf16.msra.mxu0 %v635_v21  ;;  %1058 = vmatprep.mubr.msk.bf16.mxu0 %vm1384_vm0, %v1383_v0 }
 0x47c   : > { %1068 = vmatprep.subr.bf16.mxu0 %v1383_v0 }
 0x482   : > { %1059 = vmatmul.mubr.msk.bf16.vlgmr.msra.gmra.mxu0 %vm335_vm2, %v630_v22 }
 0x483   : > { %1070 = vmatprep.mubr.msk.bf16.mxu0 %vm1384_vm0, %v1383_v0 }
 0x496   : > { %v743_v23 = vpop.xlane.xlu1 %742 }
 0x497   : > { %1178 = vrcp.f32 %v743_v23 }
 0x49a   : > { %v326_v24 = vpop.permute.xlu1 %325 }
 0x49b   : > { %329 = vst.msk [vmem:[#allocation3 + $0xc] sm:$0xf] %vm290_vm1, %v326_v24 }
 0x4a2   : > { %v686_v25 = vld [vmem:[#allocation3 + $0xc] sm:$0xf] }
 0x4a3   : > { %v754_v26 = vsel %vm399_vm3, %v686_v25, 0 }
 0x4a4   : > { %v1179_v27 = vpop.eup %1178  ;;  %1069 = vmatpush3.bf16.msra.mxu0 %v754_v26 }
 0x4a5   : > { %v746_v28 = vmul.f32 %v1179_v27, %v1173_v7 }
 0x4a7   : > { %1000 = vst.msk [vmem:[%s1619_s8 + $0x18] sm:$0xff] %vm335_vm2, %v746_v28  ;;  %v749_v29 = vpack.c.bf16 %v746_v28, %v746_v28 }
 0x4a9   : > { %1071 = vmatmul.mubr.msk.bf16.vlgmr.msra.gmra.mxu0 %vm335_vm2, %v749_v29 }
 0x53a   : > { %v552_v30 = vpop.f32.mrf.mxu0 }
 0x53b   : > { %559 = vrot.lane.b32.xlu0 %v552_v30, %s1388_s11 }
 0x53c   : > { %v1048_v0 = vpop.f32.mrf.mxu0 }
 0x53e   : > { %v555_v31 = vpop.f32.mrf.mxu0 }
 0x540   : > { %v1049_v32 = vpop.f32.mrf.mxu0 }
 0x542   : > { %v671_v33 = vpop.f32.mrf.mxu0 }
 0x543   : > { %678 = vrot.lane.b32.xlu1 %v671_v33, %s1389_s23 }
 0x544   : > { %v1060_v34 = vpop.f32.mrf.mxu0 }
 0x546   : > { %v674_v35 = vpop.f32.mrf.mxu0 }
 0x548   : > { %v1061_v36 = vpop.f32.mrf.mxu0 }
 0x569   : > { %v790_v37 = vpop.f32.mrf.mxu0 }
 0x56a   : > { %1277 = shalt.err (!%p1274_p1)
}
 0x56b   : > { %s1278_s5 = scalar_lea.hbm %s1678_s18, 512  ;;  %s1282_s23 = scalar_lea.hbm %s1758_s4, 1024 }
 0x56c   : > { %p1279_p3 = scmp.ne.s32.totalorder %s1678_s18, %s1278_s5  ;;  %p1283_p2 = scmp.lt.s32.totalorder %s1678_s18, %s1758_s4 }
 0x56d   : > { %p1284_p4 = scmp.lt.s32.totalorder %s1282_s23, %s1278_s5 }
 0x56e   : > { %p1280_p13 = pnand %p1279_p3, %p1548_p5 }
 0x56f   : > { %p1285_p6 = por %p1284_p4, %p1283_p2 }
 0x570   : > { %p1281_p9 = pneg %p1280_p13 }
 0x572   : > { %p1286_p8 = pnand %p1285_p6, %p1281_p9 }
 0x574   : > { %1289 = shalt.err (!%p1286_p8)
}
 0x575   : > { %s1391_s12 = smov 128   ;;  %s1392_s29 = smov 256   ;;  %v1072_v38 = vpop.f32.mrf.mxu0  ;;  %vm562_vm4 = vcmask 130112   ;;  %vm681_vm5 = vcmask 195712   ;;  %vm800_vm6 = vcmask 261312   ;;  %vm803_vm7 = vcmask 261120  }
 0x576   : > { %1081 = dma.vmem_to_hbm [thread:$0]  (%p1548_p5), %s1680_s13, 512, %s1678_s18, %s811_s21, %s1391_s12, %s1392_s29, %s1388_s11  }
 0x577   : > { %s1393_s24 = smov 24   ;;  %v793_v39 = vpop.f32.mrf.mxu0  ;;  %s274_s27 = scalar_lea.vmem [#allocation11], %s986_s9 }
 0x578   : > { %797 = vrot.lane.b32.xlu0 %v790_v37, %s1393_s24  ;;  %s825_s11 = sshll.u32 %s274_s27, 4  ;;  %s1712_s21 = scalar_lea.hbm %s1757_s3, %s1466_s26  ;;  %s826_s11 = int_to_ptr.vmem [resolvable:$true] %s825_s11 }
 0x579   : > { %v1073_v40 = vpop.f32.mrf.mxu0  ;;  %s806_s5 = scalar_lea.sflag [#allocation7], %s1575_s22  ;;  %s1290_s7 = scalar_lea.vmem %s826_s11, 128 }
 0x57a   : > { %p1291_p7 = scmp.ne.s32.totalorder %s826_s11, %s1290_s7  ;;  %s1394_s8 = smov [#allocation11]  }
 0x57b   : > { %s1294_s23 = sshll.u32 %s1394_s8, 4  ;;  %s1295_s23 = int_to_ptr.vmem [resolvable:$false] %s1294_s23 }
 0x57c   : > { %p1292_p11 = pnand %p1291_p7, %p1548_p5  ;;  %s1296_s9 = scalar_lea.vmem %s1295_s23, 256 }
 0x57d   : > { %p1297_p12 = scmp.lt.s32.totalorder %s826_s11, %s1295_s23  ;;  %p1298_p0 = scmp.lt.s32.totalorder %s1296_s9, %s1290_s7 }
 0x57e   : > { %p1293_p10 = pneg %p1292_p11 }
 0x57f   : > { %p1299_p1 = por %p1298_p0, %p1297_p12 }
 0x581   : > { %p1300_p3 = pnand %p1299_p1, %p1293_p10 }
 0x5ad   : > { %v560_v41 = vpop.permute.xlu0 %559 }
 0x5ae   : > { %563 = vst.msk [vmem:[#allocation4] sm:$0xff] %vm562_vm4, %v560_v41 }
 0x5b5   : > { %v679_v42 = vpop.permute.xlu1 %678 }
 0x5b6   : > { %682 = vst.msk [vmem:[#allocation4] sm:$0xff] %vm681_vm5, %v679_v42 }
 0x5ea   : > { %v798_v43 = vpop.permute.xlu0 %797 }
 0x5eb   : > { %801 = vst.msk [vmem:[#allocation4] sm:$0xff] %vm800_vm6, %v798_v43 }
 0x5f2   : > { %v802_v44 = vld [vmem:[#allocation4] sm:$0xff] }
 0x5f3   : > { %804 = vst.msk [vmem:[%s274_s27] sm:$0xff] %vm803_vm7, %v802_v44 }
 0x5f4   : > { %1303 = shalt.err (!%p1300_p3)
}
 0x5f5   : > { %s1304_s26 = scalar_lea.hbm %s1712_s21, 128  ;;  %s1308_s30 = scalar_lea.hbm %s1757_s3, 256 }
 0x5f6   : > { %p1305_p13 = scmp.ne.s32.totalorder %s1712_s21, %s1304_s26  ;;  %p1309_p4 = scmp.lt.s32.totalorder %s1712_s21, %s1757_s3 }
 0x5f7   : > { %p1310_p6 = scmp.lt.s32.totalorder %s1308_s30, %s1304_s26 }
 0x5f8   : > { %p1306_p9 = pnand %p1305_p13, %p1548_p5 }
 0x5f9   : > { %p1311_p8 = por %p1310_p6, %p1309_p4 }
 0x5fa   : > { %p1307_p2 = pneg %p1306_p9 }
 0x5fc   : > { %p1312_p7 = pnand %p1311_p8, %p1307_p2 }
 0x5fe   : > { %1315 = shalt.err (!%p1312_p7)
}
 0x5ff   : > { %1080 = dma.vmem_to_hbm [thread:$0]  (%p1548_p5), %s826_s11, 128, %s1712_s21, %s806_s5  }
 0x600 PF: > { %s853_s24 = sand.u32 1, %s1358_s15   ;;  %p1772_p11 = scmp.ne.s32.totalorder %s1764_s25, 0 }
 0x601   : > { %p1773_p10 = scmp.ge.s32.totalorder %s1378_s20, 2  ;;  %s854_s27 = scalar_lea.sflag [#allocation7], %s853_s24 }
 0x603   : > { %p1096_p12 = pnand %p1773_p10, %p1772_p11 }
 0x605   : > { %p1097_p0 = pneg %p1096_p12 }
 0x607   : > { %1349 = dma.done.wait (%p1097_p0), %s854_s27, 128  }
 0x608   : > { %1351 = vsyncadd (%p1097_p0), %s854_s27, 4294967168  ;;  %s863_s13 = scalar_lea.sflag [#allocation13], %s853_s24 }
 0x609   : > { %1353 = dma.done.wait (%p1097_p0), %s863_s13, 512  }
 0x60a   : > { %1355 = vsyncadd (%p1097_p0), %s863_s13, 4294966784  ;;  %s25_s20 = sadd.s32 1, %s1378_s20   ;;  %s1774_s15 = smov %s1362_s16 }
 0x60b   : > { %p22_p1 = scmp.ge.s32.totalorder %s25_s20, 4   ;;  %s1775_s16 = smov %s1366_s17 }
 0x60c   : > { %s1776_s17 = smov %s1557_s28  ;;  %s1777_s18 = smov %s1374_s19 }
 0x60d   : > { %s1778_s19 = smov %s1780_s6  ;;  %24 = sbr.rel (!%p22_p1) target bundleno = 9 (0x9), region = 123 }
 0x612   :  { %868 = vsyncpa [#allocation6], 1 }
 0x613   :  { %870 = vsyncpa [#allocation6 + $0x1], 1 }
 0x614   :  { %871 = vsyncpa [#allocation9], 1 }
 0x615   :  { %872 = vsyncpa [#allocation7], 1 }
 0x616   :  { %874 = vsyncpa [#allocation7 + $0x1], 1 }
 0x617   :  { %875 = vsyncpa [#allocation13], 1 }
 0x618   :  { %877 = vsyncpa [#allocation13 + $0x1], 1 }

// kernel: tpu_custom_call.1
= control target key start
LH: loop header
LB: loop body
LE: loop exit
PB: predicated region body
PF: predicated region fallthrough
CT: control target
= control target key end

     0   :  { %s1797_s0 = inlined_call_operand.hbm [shape: f32[2,8,32], index: 0, kind: input, shape index: {}]   ;;  %s1798_s1 = inlined_call_operand.hbm [shape: f32[2,8,32], index: 1, kind: input, shape index: {}]   ;;  %s1799_s2 = inlined_call_operand.hbm [shape: f32[2,8,32], index: 2, kind: input, shape index: {}]   ;;  %s1800_s3 = inlined_call_operand.hbm [shape: f32[2,8,32], index: 3, kind: output, shape index: {0}]   ;;  %s1801_s4 = inlined_call_operand.hbm [shape: f32[4,2,8,8], index: 4, kind: output, shape index: {1}]  }
   0x1   :  { %1805 = sst [smem:[#allocation21_spill]] %s1798_s1 }
   0x2   :  { %10 = vsyncpa [#allocation6], 0 }
   0x3   :  { %12 = vsyncpa [#allocation6 + $0x1], 0 }
   0x4   :  { %13 = vsyncpa [#allocation9], 0 }
   0x5   :  { %15 = vsyncpa [#allocation9 + $0x1], 0 }
   0x6   :  { %16 = vsyncpa [#allocation7], 0 }
   0x7   :  { %18 = vsyncpa [#allocation7 + $0x1], 0 }
   0x8   :  { %19 = vsyncpa [#allocation13], 0 }
   0x9   :  { %21 = vsyncpa [#allocation13 + $0x1], 0  ;;  %s1473_s15 = smov 0   ;;  %s1475_s16 = smov 0  }
   0xa   :  { %s1477_s17 = smov 0   ;;  %s1479_s18 = smov 0  }
   0xb   :  { %s1481_s19 = smov 0   ;;  %s1483_s20 = smov 0  }
   0xc LB: > { %1806 = sst [smem:[#allocation18_spill]] %s1427_s19  ;;  %s1504_s21 = sadd.s32 4294967295, %s1431_s20   ;;  %s1431_s20 = sphi %s1483_s20, %s27_s20   ;;  %s1427_s19 = sphi %s1481_s19, %s1820_s19   ;;  %s1423_s18 = sphi %s1479_s18, %s1819_s18   ;;  %s1419_s17 = sphi %s1477_s17, %s1823_s17   ;;  %s1415_s16 = sphi %s1475_s16, %s1822_s16   ;;  %s1411_s15 = sphi %s1473_s15, %s1821_s15  }
   0xd   : > { %s1030_s22 = sadd.s32 4294967294, %s1431_s20   ;;  %s39_s23 = sadd.s32 1, %s1427_s19 }
   0xe   : > { %s48_s24 = sadd.s32 1, %s1419_s17  ;;  %p41_p0 = scmp.ge.s32.totalorder %s39_s23, 2 }
   0xf   : > { %p55_p1 = scmp.ne.s32.totalorder %s1419_s17, %s1415_s16  ;;  %p56_p2 = scmp.eq.s32.totalorder %s1431_s20, 0 }
  0x10   : > { %p61_p3 = scmp.ne.s32.totalorder %s1415_s16, %s1411_s15  ;;  %s1825_s23 = smov (%p41_p0, %s39_s23), 0 }
  0x11   : > { %1807 = sst [smem:[#allocation19_spill]] %s1825_s23  ;;  %p1516_p4 = por %p56_p2, %p55_p1 }
  0x12   : > { %p62_p5 = scmp.eq.s32.totalorder %s1504_s21, 0  ;;  %s43_s26 = ssub.s32 %s1427_s19, %s1825_s23 }
  0x13   : > { %p139_p6 = scmp.eq.s32.totalorder %s1504_s21, 1  ;;  %p46_p7 = scmp.eq.s32.totalorder %s43_s26, 0 }
  0x14   : > { %p1524_p8 = por %p62_p5, %p61_p3  ;;  %p145_p10 = scmp.eq.s32.totalorder %s1030_s22, 1 }
  0x15   : > { %p1528_p9 = por %p139_p6, %p55_p1  ;;  %p1157_p13 = scmp.lt.s32.totalorder %s1431_s20, 2 }
  0x16   : > { %s1533_s29 = scalar_select %p46_p7, %s1419_s17, %s48_s24  }
  0x17   : > { %p1535_p11 = por %p145_p10, %p61_p3  ;;  %s1802_s5 = sand.u32 1, %s1419_s17  }
  0x18   : > { %1811 = sst [smem:[#allocation20_spill]] %s1533_s29  ;;  %s1544_s6 = sshll.u32 %s1802_s5, 3 }
  0x19   : > { %s1547_s7 = sshll.u32 %s1427_s19, 7  ;;  %p1551_p0 = pnand %p1157_p13, %p1516_p4 }
  0x1a   : > { %s212_s9 = sand.u32 1, %s1431_s20   ;;  %s1814_s1 = sld [smem:[#allocation21_spill]] }
  0x1b   : > { %s216_s13 = scalar_lea.vmem [#allocation8], %s1544_s6  ;;  %p1039_p1 = scmp.ge.s32.totalorder %s1431_s20, 1 }
  0x1c   : > { %s223_s14 = sshll.u32 %s216_s13, 4  ;;  %p246_p2 = scmp.lt.s32.totalorder %s1431_s20, 3  ;;  %s224_s14 = int_to_ptr.vmem [resolvable:$true] %s223_s14 }
  0x1d   : > { %s1563_s22 = scalar_lea.sflag [#allocation9], %s212_s9  ;;  %p1235_p3 = pneg %p1551_p0 }
  0x1e   : > { %s1246_s24 = scalar_lea.vmem %s224_s14, 128  ;;  %s1433_s25 = smov [#allocation8]  }
  0x1f   : > { %p1247_p4 = scmp.ne.s32.totalorder %s224_s14, %s1246_s24  ;;  %s1251_s26 = sshll.u32 %s1433_s25, 4  ;;  %s1252_s26 = int_to_ptr.vmem [resolvable:$false] %s1251_s26 }
  0x20   : > { %s221_s12 = scalar_lea.hbm %s1814_s1, %s1547_s7  ;;  %s1253_s10 = scalar_lea.vmem %s1252_s26, 256 }
  0x21   : > { %p1249_p5 = pnand %p1247_p4, %p1235_p3  ;;  %p1254_p7 = scmp.lt.s32.totalorder %s224_s14, %s1252_s26 }
  0x22   : > { %p1255_p10 = scmp.lt.s32.totalorder %s1253_s10, %s1246_s24 }
  0x23   : > { %p1250_p6 = pneg %p1249_p5 }
  0x24   : > { %p1256_p13 = por %p1255_p10, %p1254_p7 }
  0x26   : > { %p1257_p12 = pnand %p1256_p13, %p1250_p6 }
  0x28   : > { %1260 = shalt.err (!%p1257_p12)
}
  0x29   : > { %1146 = dma.hbm_to_vmem [thread:$0]  (!%p1551_p0), %s221_s12, 128, %s224_s14, %s1563_s22  }
  0x2a   : > { %p1577_p4 = pnand %p1039_p1, %p246_p2  ;;  %s203_s24 = scalar_lea.hbm %s1797_s0, %s1547_s7 }
  0x2b   : > { %s197_s25 = scalar_lea.vmem [#allocation5], %s1544_s6  ;;  %s239_s1 = scalar_lea.hbm %s1799_s2, %s1547_s7 }
  0x2c   : > { %s205_s26 = sshll.u32 %s197_s25, 4  ;;  %s1816_s23 = sand.u32 1, %s1419_s17   ;;  %s206_s26 = int_to_ptr.vmem [resolvable:$true] %s205_s26 }
  0x2d   : > { %s194_s19 = scalar_lea.sflag [#allocation6], %s1816_s23  ;;  %s1274_s12 = scalar_lea.vmem %s206_s26, 128 }
  0x2e   : > { %p1275_p12 = scmp.ne.s32.totalorder %s206_s26, %s1274_s12  ;;  %s1434_s14 = smov [#allocation5]  }
  0x2f   : > { %s1279_s29 = sshll.u32 %s1434_s14, 4  ;;  %s1280_s29 = int_to_ptr.vmem [resolvable:$false] %s1279_s29 }
  0x30   : > { %p1277_p1 = pnand %p1275_p12, %p1235_p3  ;;  %s1281_s11 = scalar_lea.vmem %s1280_s29, 256 }
  0x31   : > { %p1282_p5 = scmp.lt.s32.totalorder %s206_s26, %s1280_s29  ;;  %p1283_p6 = scmp.lt.s32.totalorder %s1281_s11, %s1274_s12 }
  0x32   : > { %p1278_p2 = pneg %p1277_p1 }
  0x33   : > { %p1284_p7 = por %p1283_p6, %p1282_p5 }
  0x35   : > { %p1285_p10 = pnand %p1284_p7, %p1278_p2 }
  0x37   : > { %1288 = shalt.err (!%p1285_p10)
}
  0x38   : > { %1143 = dma.hbm_to_vmem [thread:$0]  (!%p1551_p0), %s203_s24, 128, %s206_s26, %s194_s19  }
  0x39   : > { %s234_s23 = scalar_lea.vmem [#allocation10], %s1544_s6  ;;  %s1435_s25 = smov [#allocation10]  }
  0x3a   : > { %s241_s5 = sshll.u32 %s234_s23, 4  ;;  %s1307_s29 = sshll.u32 %s1435_s25, 4  ;;  %s242_s5 = int_to_ptr.vmem [resolvable:$true] %s241_s5  ;;  %s1308_s29 = int_to_ptr.vmem [resolvable:$false] %s1307_s29 }
  0x3b   : > { %s1302_s13 = scalar_lea.vmem %s242_s5, 128  ;;  %s1309_s10 = scalar_lea.vmem %s1308_s29, 256 }
  0x3c   : > { %p1303_p13 = scmp.ne.s32.totalorder %s242_s5, %s1302_s13  ;;  %p1310_p2 = scmp.lt.s32.totalorder %s242_s5, %s1308_s29 }
  0x3d   : > { %p1311_p5 = scmp.lt.s32.totalorder %s1309_s10, %s1302_s13 }
  0x3e   : > { %p1305_p12 = pnand %p1303_p13, %p1235_p3 }
  0x3f   : > { %p1312_p6 = por %p1311_p5, %p1310_p2 }
  0x40   : > { %p1306_p1 = pneg %p1305_p12 }
  0x42   : > { %p1313_p7 = pnand %p1312_p6, %p1306_p1 }
  0x44   : > { %1316 = shalt.err (!%p1313_p7)
}
  0x45   : > { %1149 = dma.hbm_to_vmem [thread:$0]  (!%p1551_p0), %s239_s1, 128, %s242_s5, %s1563_s22  }
  0x46   : > { %250 = sbr.rel (%p1577_p4) target bundleno = 1502 (0x5de), region = 32  ;;  %s1612_s24 = sand.u32 (!%p1577_p4), 1, %s1415_s16  }
  0x47   : > { %s1615_s26 = sshll.u32 (!%p1577_p4), %s1612_s24, 3  ;;  %s253_s8 = scalar_lea.sflag (!%p1577_p4), [#allocation6], %s1612_s24 }
  0x48   : > { %s256_s12 = scalar_lea.vmem (!%p1577_p4), [#allocation5], %s1615_s26 }
  0x4b   : > { %1394 = dma.done.wait (%p1524_p8), %s253_s8, 128  }
  0x4c   : > { %1396 = vsyncadd (%p1524_p8), %s253_s8, 4294967168  ;;  %s261_s1 = sand.u32 1, %s1504_s21   ;;  %s265_s22 = scalar_lea.vmem [#allocation8], %s1615_s26 }
  0x4d   : > { %s262_s7 = scalar_lea.sflag [#allocation9], %s261_s1 }
  0x4e   : > { %1398 = dma.done.wait (%p1524_p8), %s262_s7, 256  }
  0x4f   : > { %1400 = vsyncadd (%p1524_p8), %s262_s7, 4294967040  ;;  %v1436_v0 = vmov 0.0   ;;  %vm1437_vm0 = vmmov 0   ;;  %v319_v1 = vld [vmem:[%s265_s22] sm:$0xff]  ;;  %vm322_vm1 = vcmask 60416   ;;  %vm367_vm2 = vcmask 64512  }
  0x50   : > { %1082 = vmatprep.subr.bf16.mxu0 %v1436_v0  ;;  %1084 = vmatprep.mubr.msk.bf16.mxu0 %vm1437_vm0, %v1436_v0  ;;  %v321_v2 = vpack.c.bf16 %v319_v1, %v319_v1  ;;  %v362_v3 = vld [vmem:[%s256_s12] sm:$0xff]  ;;  %s1438_s21 = smov 120   ;;  %s1439_s27 = smov 112   ;;  %vm431_vm3 = vcmask 1043456  }
  0x51   : > { %1088 = vmatprep.subr.bf16.mxu1 %v1436_v0  ;;  %1090 = vmatprep.mubr.msk.bf16.mxu1 %vm1437_vm0, %v1436_v0  ;;  %v363_v6 = vmul.f32 0.35355338, %v362_v3  ;;  %s1440_s9 = smov 104   ;;  %s274_s14 = scalar_lea.vmem [#allocation10], %s1615_s26 }
  0x52   : > { %323 = vst.msk [vmem:[#allocation2] sm:$0xf] %vm322_vm1, %v321_v2  ;;  %329 = vrot.lane.b32.xlu1 %v321_v2, %s1438_s21  ;;  %v320_v19 = vld [vmem:[%s274_s14] sm:$0xff]  ;;  %s1044_s11 = sshll.u32 %s1612_s24, 5  ;;  %s1441_s5 = smov 8  }
  0x53   : > { %v364_v7 = vpack.c.bf16 %v363_v6, %v363_v6  ;;  %v1650_v20 = vpack.c.bf16 %v320_v19, %v320_v19  ;;  %s1660_s23 = scalar_lea.vmem [#allocation12], %s1044_s11  ;;  %s1442_s13 = smov 16  }
  0x54   : > { %s1060_s25 = sshll.u32 %s1423_s18, 7  ;;  %s870_s6 = sshll.u32 %s1660_s23, 4  ;;  %s1723_s6 = int_to_ptr.vmem [resolvable:$true] %s870_s6 }
  0x55   : > { %325 = vst.msk [vmem:[#allocation3] sm:$0xf] %vm322_vm1, %v1650_v20  ;;  %s1720_s19 = scalar_lea.hbm %s1801_s4, %s1060_s25  ;;  %s1443_s8 = smov 24  }
  0x56   : > { %342 = vrot.lane.b32.xlu1 %v321_v2, %s1439_s27  ;;  %s843_s12 = scalar_lea.sflag [#allocation13], %s1612_s24  ;;  %s1317_s1 = scalar_lea.vmem %s1723_s6, 512 }
  0x57   : > { %p1318_p8 = scmp.ne.s32.totalorder %s1723_s6, %s1317_s1  ;;  %s1444_s7 = smov [#allocation12]  }
  0x58   : > { %s1321_s22 = sshll.u32 %s1444_s7, 4  ;;  %s1322_s22 = int_to_ptr.vmem [resolvable:$false] %s1321_s22 }
  0x59   : > { %v365_v4 = vld [vmem:[#allocation2] sm:$0xf]  ;;  %p1319_p0 = pnand %p1318_p8, %p1528_p9  ;;  %p1324_p4 = scmp.lt.s32.totalorder %s1723_s6, %s1322_s22 }
  0x5a   : > { %v372_v5 = vsel %vm367_vm2, %v365_v4, 0  ;;  %481 = vrot.lane.b32.xlu1 %v364_v7, %s1438_s21 }
  0x5b   : > { %1083 = vmatpush3.bf16.xpose.msra.mxu0 %v372_v5  ;;  %p1320_p3 = pneg %p1319_p0 }
  0x5c   : > { %1100 = vmatprep.subr.bf16.mxu0 %v1436_v0  ;;  %v366_v22 = vld [vmem:[#allocation3] sm:$0xf] }
  0x5d   : > { %v433_v23 = vsel %vm431_vm3, %v366_v22, 0 }
  0x5e   : > { %600 = vrot.lane.b32.xlu1 %v364_v7, %s1439_s27  ;;  %1089 = vmatpush3.bf16.msra.mxu1 %v433_v23 }
  0x5f   : > { %1094 = vmatprep.subr.bf16.mxu1 %v1436_v0 }
  0x62   : > { %1085 = vmatmul.mubr.msk.bf16.vlgmr.msra.gmra.mxu0 %vm367_vm2, %v364_v7  ;;  %719 = vrot.lane.b32.xlu1 %v364_v7, %s1440_s9 }
  0x63   : > { %1102 = vmatprep.mubr.msk.bf16.mxu0 %vm1437_vm0, %v1436_v0 }
  0xc4   : > { %v330_v18 = vpop.permute.xlu1 %329 }
  0xc5   : > { %333 = vst.msk [vmem:[#allocation2 + $0x4] sm:$0xf] %vm322_vm1, %v330_v18 }
  0xc8   : > { %v343_v21 = vpop.permute.xlu1 %342 }
  0xc9   : > { %346 = vst.msk [vmem:[#allocation2 + $0x8] sm:$0xf] %vm322_vm1, %v343_v21 }
  0xcc   : > { %v477_v27 = vld [vmem:[#allocation2 + $0x4] sm:$0xf]  ;;  %v482_v32 = vpop.permute.xlu1 %481 }
  0xcd   : > { %v487_v30 = vsel %vm367_vm2, %v477_v27, 0 }
  0xd0   : > { %v597_v31 = vld [vmem:[#allocation2 + $0x8] sm:$0xf]  ;;  %v601_v35 = vpop.permute.xlu1 %600 }
  0xd1   : > { %v606_v33 = vsel %vm367_vm2, %v597_v31, 0 }
  0xd4   : > { %v720_v37 = vpop.permute.xlu1 %719 }
 0x122   : > { %v408_v8 = vpop.f32.mrf.mxu0 }
 0x123   : > { %v414_v9 = vsel %vm367_vm2, %v408_v8, -inf }
 0x124   : > { %415 = vmax.xlane.f32.xlu0 %v414_v9  ;;  %v1086_v10 = vpop.f32.mrf.mxu0 }
 0x126   : > { %v411_v11 = vpop.f32.mrf.mxu0 }
 0x128   : > { %v1087_v12 = vpop.f32.mrf.mxu0 }
 0x1ad   : > { %v416_v13 = vpop.xlane.xlu0 %415 }
 0x1ae   : > { %v417_v14 = vsub.f32 %v408_v8, %v416_v13 }
 0x1b0   : > { %v418_v15 = vmul.f32 1.442695, %v417_v14 }
 0x1b2   : > { %1217 = vpow2.f32 %v418_v15 }
 0x1bf   : > { %v1218_v16 = vpop.eup %1217 }
 0x1c0   : > { %v420_v17 = vsel %vm367_vm2, %v1218_v16, 0.0 }
 0x1c1   : > { %421 = vadd.xlane.f32.xlu0 %v420_v17 }
 0x1d7   : > { %352 = vrot.lane.b32.xlu0 %v321_v2, %s1440_s9 }
 0x24a   : > { %v422_v24 = vpop.xlane.xlu0 %421 }
 0x24b   : > { %1219 = vrcp.f32 %v422_v24 }
 0x24e   : > { %v353_v25 = vpop.permute.xlu0 %352 }
 0x24f   : > { %356 = vst.msk [vmem:[#allocation2 + $0xc] sm:$0xf] %vm322_vm1, %v353_v25 }
 0x256   : > { %v716_v34 = vld [vmem:[#allocation2 + $0xc] sm:$0xf] }
 0x257   : > { %v725_v36 = vsel %vm367_vm2, %v716_v34, 0 }
 0x258   : > { %v1220_v26 = vpop.eup %1219 }
 0x259   : > { %v425_v28 = vmul.f32 %v1220_v26, %v1218_v16 }
 0x25b   : > { %426 = vst.msk [vmem:[%s1660_s23] sm:$0xff] %vm367_vm2, %v425_v28  ;;  %v427_v29 = vpack.c.bf16 %v425_v28, %v425_v28 }
 0x25d   : > { %1091 = vmatmul.mubr.msk.bf16.vlgmr.msra.gmra.mxu1 %vm367_vm2, %v427_v29 }
 0x25e   : > { %1095 = vmatpush3.bf16.xpose.msra.mxu1 %v487_v30  ;;  %1096 = vmatprep.mubr.msk.bf16.mxu1 %vm1437_vm0, %v1436_v0 }
 0x25f   : > { %1106 = vmatprep.subr.bf16.mxu1 %v1436_v0 }
 0x265   : > { %1097 = vmatmul.mubr.msk.bf16.vlgmr.msra.gmra.mxu1 %vm367_vm2, %v482_v32 }
 0x266   : > { %1107 = vmatpush3.bf16.xpose.msra.mxu1 %v606_v33  ;;  %1108 = vmatprep.mubr.msk.bf16.mxu1 %vm1437_vm0, %v1436_v0 }
 0x267   : > { %1118 = vmatprep.subr.bf16.mxu1 %v1436_v0 }
 0x26d   : > { %1109 = vmatmul.mubr.msk.bf16.vlgmr.msra.gmra.mxu1 %vm367_vm2, %v601_v35 }
 0x26e   : > { %1119 = vmatpush3.bf16.xpose.msra.mxu1 %v725_v36  ;;  %1120 = vmatprep.mubr.msk.bf16.mxu1 %vm1437_vm0, %v1436_v0 }
 0x275   : > { %1121 = vmatmul.mubr.msk.bf16.vlgmr.msra.gmra.mxu1 %vm367_vm2, %v720_v37 }
 0x31d   : > { %v469_v38 = vpop.f32.mrf.mxu1 }
 0x31e   : > { %475 = vst.msk [vmem:[#allocation4] sm:$0xff] %vm367_vm2, %v469_v38 }
 0x31f   : > { %v1092_v39 = vpop.f32.mrf.mxu1 }
 0x321   : > { %v472_v40 = vpop.f32.mrf.mxu1 }
 0x323   : > { %v1093_v41 = vpop.f32.mrf.mxu1 }
 0x325   : > { %v523_v42 = vpop.f32.mrf.mxu1 }
 0x326   : > { %v529_v43 = vsel %vm367_vm2, %v523_v42, -inf }
 0x327   : > { %530 = vmax.xlane.f32.xlu1 %v529_v43  ;;  %v1098_v44 = vpop.f32.mrf.mxu1 }
 0x329   : > { %v526_v45 = vpop.f32.mrf.mxu1 }
 0x32b   : > { %v1099_v46 = vpop.f32.mrf.mxu1 }
 0x32d   : > { %v642_v47 = vpop.f32.mrf.mxu1 }
 0x32e   : > { %v648_v48 = vsel %vm367_vm2, %v642_v47, -inf }
 0x32f   : > { %649 = vmax.xlane.f32.xlu0 %v648_v48  ;;  %v1110_v49 = vpop.f32.mrf.mxu1 }
 0x331   : > { %v645_v50 = vpop.f32.mrf.mxu1 }
 0x333   : > { %v1111_v51 = vpop.f32.mrf.mxu1 }
 0x335   : > { %v761_v52 = vpop.f32.mrf.mxu1 }
 0x336   : > { %v767_v53 = vsel %vm367_vm2, %v761_v52, -inf }
 0x337   : > { %768 = vmax.xlane.f32.xlu1 %v767_v53  ;;  %v1122_v54 = vpop.f32.mrf.mxu1 }
 0x339   : > { %v764_v55 = vpop.f32.mrf.mxu1 }
 0x33b   : > { %v1123_v56 = vpop.f32.mrf.mxu1 }
 0x3b0   : > { %v531_v57 = vpop.xlane.xlu1 %530 }
 0x3b1   : > { %v532_v58 = vsub.f32 %v523_v42, %v531_v57 }
 0x3b3   : > { %v533_v59 = vmul.f32 1.442695, %v532_v58 }
 0x3b5   : > { %1221 = vpow2.f32 %v533_v59 }
 0x3b8   : > { %v650_v60 = vpop.xlane.xlu0 %649 }
 0x3b9   : > { %v651_v61 = vsub.f32 %v642_v47, %v650_v60 }
 0x3bb   : > { %v652_v62 = vmul.f32 1.442695, %v651_v61 }
 0x3bd   : > { %1223 = vpow2.f32 %v652_v62 }
 0x3c0   : > { %v769_v4 = vpop.xlane.xlu1 %768 }
 0x3c1   : > { %v770_v5 = vsub.f32 %v761_v52, %v769_v4 }
 0x3c2   : > { %v1222_v63 = vpop.eup %1221 }
 0x3c3   : > { %v535_v1 = vsel %vm367_vm2, %v1222_v63, 0.0  ;;  %v771_v6 = vmul.f32 1.442695, %v770_v5 }
 0x3c4   : > { %536 = vadd.xlane.f32.xlu1 %v535_v1 }
 0x3c5   : > { %1225 = vpow2.f32 %v771_v6 }
 0x3ca   : > { %v1224_v2 = vpop.eup %1223 }
 0x3cb   : > { %v654_v3 = vsel %vm367_vm2, %v1224_v2, 0.0 }
 0x3cc   : > { %655 = vadd.xlane.f32.xlu0 %v654_v3 }
 0x3d2   : > { %v1226_v7 = vpop.eup %1225 }
 0x3d3   : > { %v773_v8 = vsel %vm367_vm2, %v1226_v7, 0.0 }
 0x3d5   : > { %347 = vrot.lane.b32.xlu1 %v1650_v20, %s1439_s27 }
 0x3e2   : > { %337 = vrot.lane.b32.xlu0 %v1650_v20, %s1438_s21  ;;  %s1323_s21 = scalar_lea.vmem %s1322_s22, 1024 }
 0x3e3   : > { %p1325_p10 = scmp.lt.s32.totalorder %s1323_s21, %s1317_s1 }
 0x3e5   : > { %p1326_p13 = por %p1325_p10, %p1324_p4 }
 0x3e7   : > { %p1327_p12 = pnand %p1326_p13, %p1320_p3 }
 0x3f9   : > { %774 = vadd.xlane.f32.xlu1 %v773_v8 }
 0x40a   : > { %357 = vrot.lane.b32.xlu1 %v1650_v20, %s1440_s9 }
 0x44d   : > { %v537_v9 = vpop.xlane.xlu1 %536 }
 0x44e   : > { %1227 = vrcp.f32 %v537_v9 }
 0x451   : > { %v348_v10 = vpop.permute.xlu1 %347 }
 0x452   : > { %351 = vst.msk [vmem:[#allocation3 + $0x8] sm:$0xf] %vm322_vm1, %v348_v10 }
 0x455   : > { %v656_v11 = vpop.xlane.xlu0 %655 }
 0x456   : > { %1229 = vrcp.f32 %v656_v11 }
 0x459   : > { %v338_v12 = vpop.permute.xlu0 %337  ;;  %v599_v18 = vld [vmem:[#allocation3 + $0x8] sm:$0xf] }
 0x45a   : > { %341 = vst.msk [vmem:[#allocation3 + $0x4] sm:$0xf] %vm322_vm1, %v338_v12  ;;  %v667_v21 = vsel %vm431_vm3, %v599_v18, 0 }
 0x45b   : > { %v1228_v13 = vpop.eup %1227 }
 0x45c   : > { %v540_v14 = vmul.f32 %v1228_v13, %v1222_v63 }
 0x45e   : > { %1050 = vst.msk [vmem:[%s1660_s23 + $0x8] sm:$0xff] %vm367_vm2, %v540_v14  ;;  %v543_v19 = vpack.c.bf16 %v540_v14, %v540_v14 }
 0x461   : > { %v479_v15 = vld [vmem:[#allocation3 + $0x4] sm:$0xf] }
 0x462   : > { %v548_v16 = vsel %vm431_vm3, %v479_v15, 0 }
 0x463   : > { %v1230_v17 = vpop.eup %1229  ;;  %1101 = vmatpush3.bf16.msra.mxu0 %v548_v16 }
 0x464   : > { %1112 = vmatprep.subr.bf16.mxu0 %v1436_v0  ;;  %v659_v20 = vmul.f32 %v1230_v17, %v1224_v2 }
 0x466   : > { %1103 = vmatmul.mubr.msk.bf16.vlgmr.msra.gmra.mxu0 %vm367_vm2, %v543_v19  ;;  %1053 = vst.msk [vmem:[%s1660_s23 + $0x10] sm:$0xff] %vm367_vm2, %v659_v20  ;;  %v662_v22 = vpack.c.bf16 %v659_v20, %v659_v20 }
 0x467   : > { %1113 = vmatpush3.bf16.msra.mxu0 %v667_v21  ;;  %1114 = vmatprep.mubr.msk.bf16.mxu0 %vm1437_vm0, %v1436_v0 }
 0x468   : > { %1124 = vmatprep.subr.bf16.mxu0 %v1436_v0 }
 0x46e   : > { %1115 = vmatmul.mubr.msk.bf16.vlgmr.msra.gmra.mxu0 %vm367_vm2, %v662_v22 }
 0x46f   : > { %1126 = vmatprep.mubr.msk.bf16.mxu0 %vm1437_vm0, %v1436_v0 }
 0x482   : > { %v775_v23 = vpop.xlane.xlu1 %774 }
 0x483   : > { %1231 = vrcp.f32 %v775_v23 }
 0x486   : > { %v358_v24 = vpop.permute.xlu1 %357 }
 0x487   : > { %361 = vst.msk [vmem:[#allocation3 + $0xc] sm:$0xf] %vm322_vm1, %v358_v24 }
 0x48e   : > { %v718_v25 = vld [vmem:[#allocation3 + $0xc] sm:$0xf] }
 0x48f   : > { %v786_v26 = vsel %vm431_vm3, %v718_v25, 0 }
 0x490   : > { %v1232_v27 = vpop.eup %1231  ;;  %1125 = vmatpush3.bf16.msra.mxu0 %v786_v26 }
 0x491   : > { %v778_v28 = vmul.f32 %v1232_v27, %v1226_v7 }
 0x493   : > { %1056 = vst.msk [vmem:[%s1660_s23 + $0x18] sm:$0xff] %vm367_vm2, %v778_v28  ;;  %v781_v29 = vpack.c.bf16 %v778_v28, %v778_v28 }
 0x495   : > { %1127 = vmatmul.mubr.msk.bf16.vlgmr.msra.gmra.mxu0 %vm367_vm2, %v781_v29 }
 0x526   : > { %v584_v0 = vpop.f32.mrf.mxu0 }
 0x527   : > { %591 = vrot.lane.b32.xlu0 %v584_v0, %s1441_s5 }
 0x528   : > { %v1104_v30 = vpop.f32.mrf.mxu0 }
 0x52a   : > { %v587_v31 = vpop.f32.mrf.mxu0 }
 0x52c   : > { %v1105_v32 = vpop.f32.mrf.mxu0 }
 0x52e   : > { %v703_v33 = vpop.f32.mrf.mxu0 }
 0x52f   : > { %710 = vrot.lane.b32.xlu1 %v703_v33, %s1442_s13 }
 0x530   : > { %v1116_v34 = vpop.f32.mrf.mxu0 }
 0x532   : > { %v706_v35 = vpop.f32.mrf.mxu0 }
 0x534   : > { %v1117_v36 = vpop.f32.mrf.mxu0 }
 0x555   : > { %v822_v37 = vpop.f32.mrf.mxu0 }
 0x556   : > { %829 = vrot.lane.b32.xlu0 %v822_v37, %s1443_s8 }
 0x557   : > { %v1128_v38 = vpop.f32.mrf.mxu0 }
 0x558   : > { %1330 = shalt.err (!%p1327_p12)
}
 0x559   : > { %s1331_s27 = scalar_lea.hbm %s1720_s19, 512  ;;  %s1335_s11 = scalar_lea.hbm %s1801_s4, 1024 }
 0x55a   : > { %p1332_p1 = scmp.ne.s32.totalorder %s1720_s19, %s1331_s27  ;;  %p1336_p6 = scmp.lt.s32.totalorder %s1720_s19, %s1801_s4 }
 0x55b   : > { %p1337_p7 = scmp.lt.s32.totalorder %s1335_s11, %s1331_s27 }
 0x55c   : > { %p1333_p2 = pnand %p1332_p1, %p1528_p9 }
 0x55d   : > { %p1338_p8 = por %p1337_p7, %p1336_p6 }
 0x55e   : > { %p1334_p5 = pneg %p1333_p2 }
 0x560   : > { %p1339_p0 = pnand %p1338_p8, %p1334_p5 }
 0x562   : > { %1342 = shalt.err (!%p1339_p0)
}
 0x563   : > { %s1445_s29 = smov 128   ;;  %s1446_s10 = smov 256   ;;  %v825_v39 = vpop.f32.mrf.mxu0  ;;  %vm594_vm4 = vcmask 130112   ;;  %vm713_vm5 = vcmask 195712   ;;  %vm832_vm6 = vcmask 261312   ;;  %vm835_vm7 = vcmask 261120  }
 0x564   : > { %1137 = dma.vmem_to_hbm [thread:$0]  (%p1528_p9), %s1723_s6, 512, %s1720_s19, %s843_s12, %s1445_s29, %s1446_s10, %s1441_s5  }
 0x565   : > { %v1129_v40 = vpop.f32.mrf.mxu0  ;;  %s306_s8 = scalar_lea.vmem [#allocation11], %s1615_s26  ;;  %s1755_s5 = scalar_lea.hbm %s1800_s3, %s1060_s25 }
 0x566   : > { %s857_s1 = sshll.u32 %s306_s8, 4  ;;  %s838_s19 = scalar_lea.sflag [#allocation7], %s1612_s24  ;;  %s858_s1 = int_to_ptr.vmem [resolvable:$true] %s857_s1 }
 0x567   : > { %s1343_s6 = scalar_lea.vmem %s858_s1, 128  ;;  %s1447_s12 = smov [#allocation11]  }
 0x568   : > { %p1344_p3 = scmp.ne.s32.totalorder %s858_s1, %s1343_s6  ;;  %s1347_s21 = sshll.u32 %s1447_s12, 4  ;;  %s1348_s21 = int_to_ptr.vmem [resolvable:$false] %s1347_s21 }
 0x569   : > { %s1349_s26 = scalar_lea.vmem %s1348_s21, 256  ;;  %p1350_p13 = scmp.lt.s32.totalorder %s858_s1, %s1348_s21 }
 0x56a   : > { %p1345_p4 = pnand %p1344_p3, %p1528_p9  ;;  %p1351_p12 = scmp.lt.s32.totalorder %s1349_s26, %s1343_s6 }
 0x56c   : > { %p1346_p10 = pneg %p1345_p4  ;;  %p1352_p1 = por %p1351_p12, %p1350_p13 }
 0x56e   : > { %p1353_p2 = pnand %p1352_p1, %p1346_p10 }
 0x599   : > { %v592_v41 = vpop.permute.xlu0 %591 }
 0x59a   : > { %595 = vst.msk [vmem:[#allocation4] sm:$0xff] %vm594_vm4, %v592_v41 }
 0x5a1   : > { %v711_v42 = vpop.permute.xlu1 %710 }
 0x5a2   : > { %714 = vst.msk [vmem:[#allocation4] sm:$0xff] %vm713_vm5, %v711_v42 }
 0x5c8   : > { %v830_v43 = vpop.permute.xlu0 %829 }
 0x5c9   : > { %833 = vst.msk [vmem:[#allocation4] sm:$0xff] %vm832_vm6, %v830_v43 }
 0x5d0   : > { %v834_v44 = vld [vmem:[#allocation4] sm:$0xff] }
 0x5d1   : > { %836 = vst.msk [vmem:[%s306_s8] sm:$0xff] %vm835_vm7, %v834_v44 }
 0x5d2   : > { %1356 = shalt.err (!%p1353_p2)
}
 0x5d3   : > { %s1357_s18 = scalar_lea.hbm %s1755_s5, 128  ;;  %s1361_s27 = scalar_lea.hbm %s1800_s3, 256 }
 0x5d4   : > { %p1358_p5 = scmp.ne.s32.totalorder %s1755_s5, %s1357_s18  ;;  %p1362_p8 = scmp.lt.s32.totalorder %s1755_s5, %s1800_s3 }
 0x5d5   : > { %p1363_p0 = scmp.lt.s32.totalorder %s1361_s27, %s1357_s18 }
 0x5d6   : > { %p1359_p6 = pnand %p1358_p5, %p1528_p9 }
 0x5d7   : > { %p1364_p3 = por %p1363_p0, %p1362_p8 }
 0x5d8   : > { %p1360_p7 = pneg %p1359_p6 }
 0x5da   : > { %p1365_p4 = pnand %p1364_p3, %p1360_p7 }
 0x5dc   : > { %1368 = shalt.err (!%p1365_p4)
}
 0x5dd   : > { %1136 = dma.vmem_to_hbm [thread:$0]  (%p1528_p9), %s858_s1, 128, %s1755_s5, %s838_s19  }
 0x5de PF: > { %s885_s11 = sand.u32 1, %s1411_s15   ;;  %p1817_p10 = scmp.ge.s32.totalorder %s1431_s20, 2 }
 0x5df   : > { %s886_s23 = scalar_lea.sflag [#allocation7], %s885_s11 }
 0x5e0   : > { %p1151_p13 = pnand %p1817_p10, %p1535_p11 }
 0x5e2   : > { %p1152_p12 = pneg %p1151_p13 }
 0x5e4   : > { %1402 = dma.done.wait (%p1152_p12), %s886_s23, 128  }
 0x5e5   : > { %1404 = vsyncadd (%p1152_p12), %s886_s23, 4294967168  ;;  %s895_s13 = scalar_lea.sflag [#allocation13], %s885_s11 }
 0x5e6   : > { %1406 = dma.done.wait (%p1152_p12), %s895_s13, 512  }
 0x5e7   : > { %1408 = vsyncadd (%p1152_p12), %s895_s13, 4294966784  ;;  %s27_s20 = sadd.s32 1, %s1431_s20   ;;  %s1818_s28 = sld [smem:[#allocation20_spill]] }
 0x5e8   : > { %p24_p1 = scmp.ge.s32.totalorder %s27_s20, 4   ;;  %s1819_s18 = sld [smem:[#allocation18_spill]] }
 0x5e9   : > { %s1820_s19 = sld [smem:[#allocation19_spill]]  ;;  %s1821_s15 = smov %s1415_s16 }
 0x5ea   : > { %s1822_s16 = smov %s1419_s17  ;;  %26 = sbr.rel (!%p24_p1) target bundleno = 12 (0xc), region = 137 }
 0x5ed   : > { %s1823_s17 = smov %s1818_s28 }
 0x5ef   :  { %900 = vsyncpa [#allocation6], 1 }
 0x5f0   :  { %902 = vsyncpa [#allocation6 + $0x1], 1 }
 0x5f1   :  { %903 = vsyncpa [#allocation9], 1 }
 0x5f2   :  { %905 = vsyncpa [#allocation9 + $0x1], 1 }
 0x5f3   :  { %906 = vsyncpa [#allocation7], 1 }
 0x5f4   :  { %908 = vsyncpa [#allocation7 + $0x1], 1 }
 0x5f5   :  { %909 = vsyncpa [#allocation13], 1 }
 0x5f6   :  { %911 = vsyncpa [#allocation13 + $0x1], 1 }

</bundles_post_ra>
